<compile_context>
chip_gen: v5e
topology: v5e:2x2
jax: 0.10.0
libtpu: 0.0.40
codegen_flags: <defaults>
</compile_context>

<pallas_src>
import jax
import jax.numpy as jnp
from jax.experimental import pallas as pl
from jax.experimental.pallas import tpu as pltpu

LANES = 128

_CPARAMS = pltpu.CompilerParams(
    dimension_semantics=("parallel",),
    vmem_limit_bytes=32 * 1024 * 1024,
)


def _round_up(x, m):
    return ((x + m - 1) // m) * m


def _pick_tile(m, *, max_tm=512, granule=16):
    """Pick (tile_rows, padded_rows).

    - tiles capped at 512 rows (85%+ of HBM roofline per measured BlockSpec sweeps),
    - single-block cases with enough rows are split in two so v7x's second TensorCore
      gets work via the "parallel" grid axis,
    - rows are multiples of 16 (bf16 sublane packing).
    """
    if m < 4 * granule:
        tm = _round_up(m, granule)
    else:
        nblk = max(2, -(-m // max_tm))
        tm = _round_up(-(-m // nblk), granule)
    return tm, _round_up(m, tm)


# ----------------------------------------------------------------------------
# Pallas kernels
# ----------------------------------------------------------------------------
def _conv_pool_kernel(p_ref, w_ref, b_ref, o_ref):
    """Fused conv(as im2col matmul) + MaxPool2x2 + bias + ReLU.

    p_ref: (4, TM, Kp) bf16 -- patches for the 4 positions of each 2x2 pool window
           (rows are pooled-output pixels).
    w_ref: (Kp, 128) bf16, b_ref: (1, 128) f32, o_ref: (TM, 128) bf16.
    """
    p = p_ref[...]                                   # (4, TM, Kp)
    four, tm, kp = p.shape
    # One MXU pass for all 4 pool positions: RHS pushed once.
    z = jnp.dot(p.reshape(four * tm, kp), w_ref[...],
                preferred_element_type=jnp.float32)  # (4*TM, 128) f32
    z = z.reshape(four, tm, z.shape[-1])
    z = jnp.maximum(jnp.maximum(z[0], z[1]), jnp.maximum(z[2], z[3]))
    o_ref[...] = jnp.maximum(z + b_ref[...], 0.0).astype(o_ref.dtype)


def _mlp_kernel(x_ref, w1_ref, b1_ref, w2_ref, b2_ref, w3_ref, b3_ref, o_ref):
    """Fused relu(x@w1+b1) -> relu(.@w2+b2) -> .@w3+b3 (all weights in VMEM).

    x_ref is bf16 (comes straight from the bf16 conv2 output); accumulation is f32.
    """
    h = jnp.dot(x_ref[...], w1_ref[...], preferred_element_type=jnp.float32)
    h = jnp.maximum(h + b1_ref[...], 0.0)
    h = jnp.dot(h.astype(jnp.bfloat16), w2_ref[...],
                preferred_element_type=jnp.float32)
    h = jnp.maximum(h + b2_ref[...], 0.0)
    h = jnp.dot(h.astype(jnp.bfloat16), w3_ref[...],
                preferred_element_type=jnp.float32)
    o_ref[...] = h + b3_ref[...]


# ----------------------------------------------------------------------------
# Wrappers
# ----------------------------------------------------------------------------
def _pooled_im2col(x_nhwc, k, kp):
    """(4, N*Hop*Wop, kp) bf16 patches.

    Entry p = 2*pi + pj holds the im2col row of conv-output position
    (2*hp + pi, 2*wp + pj) for pooled output pixel (n, hp, wp).
    Feature order is (kh, kw, in_c), zero-padded to kp.  Odd conv-output sizes are
    floored, matching PyTorch MaxPool2d(2, 2).
    """
    x = x_nhwc.astype(jnp.bfloat16)
    n, h, w, c = x.shape
    ho, wo = h - k + 1, w - k + 1
    hp, wp = ho // 2, wo // 2
    kk = k * k * c
    cols = jnp.concatenate(
        [x[:, di:di + ho, dj:dj + wo, :] for di in range(k) for dj in range(k)],
        axis=-1)                                                # (n, ho, wo, k*k*c)
    views = [cols[:, i:i + 2 * hp:2, j:j + 2 * wp:2, :].reshape(n * hp * wp, kk)
             for i in (0, 1) for j in (0, 1)]
    patches = jnp.stack(views, axis=0)                          # (4, M, k*k*c)
    return jnp.pad(patches, ((0, 0), (0, 0), (0, kp - kk)))


def conv_relu_pool_pallas(x_nhwc, w_packed, b_packed, *, k=5):
    """MaxPool2d(2,2)(relu(conv2d(x, w) + b)), fused into one Pallas kernel.

    x_nhwc: (N, H, W, C) real channels.  w_packed: (Kp, 128) bf16 (feature order
    kh,kw,ic).  b_packed: (1, 128) f32.  Returns (N, Hop, Wop, 128) bf16 with the
    real output channels in lanes [0, OC) and zeros in the pad lanes.
    """
    n, h, w, _ = x_nhwc.shape
    hop, wop = (h - k + 1) // 2, (w - k + 1) // 2
    m = n * hop * wop
    kp, ocp = w_packed.shape

    patches = _pooled_im2col(x_nhwc, k, kp)                     # (4, M, Kp) bf16

    tm, mp = _pick_tile(m)
    if mp != m:
        patches = jnp.pad(patches, ((0, 0), (0, mp - m), (0, 0)))

    out = pl.pallas_call(
        _conv_pool_kernel,
        out_shape=jax.ShapeDtypeStruct((mp, ocp), jnp.bfloat16),
        grid_spec=pltpu.PrefetchScalarGridSpec(
            num_scalar_prefetch=0,
            grid=(mp // tm,),
            in_specs=[
                pl.BlockSpec((4, tm, kp), lambda i: (0, i, 0)),
                pl.BlockSpec((kp, ocp), lambda i: (0, 0)),
                pl.BlockSpec((1, ocp), lambda i: (0, 0)),
            ],
            out_specs=pl.BlockSpec((tm, ocp), lambda i: (i, 0)),
        ),
        compiler_params=_CPARAMS,
    )(patches, w_packed, b_packed)
    return out[:m].reshape(n, hop, wop, ocp)


def mlp_pallas(x, w1, b1, w2, b2, w3, b3):
    """Fused 3-layer MLP.  x: (M, K) bf16; all widths lane-padded to 128."""
    m, kdim = x.shape
    tm, mp = _pick_tile(m)
    if mp != m:
        x = jnp.pad(x, ((0, mp - m), (0, 0)))

    out = pl.pallas_call(
        _mlp_kernel,
        out_shape=jax.ShapeDtypeStruct((mp, LANES), jnp.float32),
        grid_spec=pltpu.PrefetchScalarGridSpec(
            num_scalar_prefetch=0,
            grid=(mp // tm,),
            in_specs=[
                pl.BlockSpec((tm, kdim), lambda i: (i, 0)),
                pl.BlockSpec((kdim, LANES), lambda i: (0, 0)),
                pl.BlockSpec((1, LANES), lambda i: (0, 0)),
                pl.BlockSpec((LANES, LANES), lambda i: (0, 0)),
                pl.BlockSpec((1, LANES), lambda i: (0, 0)),
                pl.BlockSpec((LANES, LANES), lambda i: (0, 0)),
                pl.BlockSpec((1, LANES), lambda i: (0, 0)),
            ],
            out_specs=pl.BlockSpec((tm, LANES), lambda i: (i, 0)),
        ),
        compiler_params=_CPARAMS,
    )(x, w1, b1, w2, b2, w3, b3)
    return out[:m]


# ----------------------------------------------------------------------------
# Parameters (deterministic, shapes from Net.__init__) and one-time packing
# ----------------------------------------------------------------------------
def init_params(key):
    ks = jax.random.split(key, 10)

    def u(k, shape, fan_in):
        bound = 1.0 / jnp.sqrt(float(fan_in))
        return jax.random.uniform(k, shape, jnp.float32, -bound, bound)

    return {
        "conv1_w": u(ks[0], (6, 3, 5, 5), 3 * 5 * 5),
        "conv1_b": u(ks[1], (6,), 3 * 5 * 5),
        "conv2_w": u(ks[2], (16, 6, 5, 5), 6 * 5 * 5),
        "conv2_b": u(ks[3], (16,), 6 * 5 * 5),
        "fc1_w": u(ks[4], (120, 400), 400),   # PyTorch Linear layout: (out, in)
        "fc1_b": u(ks[5], (120,), 400),
        "fc2_w": u(ks[6], (84, 120), 120),
        "fc2_b": u(ks[7], (84,), 120),
        "fc3_w": u(ks[8], (10, 84), 84),
        "fc3_b": u(ks[9], (10,), 84),
    }


def prepare_params(p):
    """One-time packing: transpose/pad weights into kernel-ready bf16 layouts."""
    def pack_conv(w_oihw, b, kp):
        oc, ic, kh, kw = w_oihw.shape
        w = jnp.transpose(w_oihw, (2, 3, 1, 0)).reshape(kh * kw * ic, oc)  # (kh,kw,ic) x oc
        w = jnp.pad(w, ((0, kp - kh * kw * ic), (0, LANES - oc)))
        return (w.astype(jnp.bfloat16),
                jnp.pad(b, (0, LANES - oc)).reshape(1, LANES).astype(jnp.float32))

    c1w, c1b = pack_conv(p["conv1_w"], p["conv1_b"], kp=128)   # K: 75  -> 128
    c2w, c2b = pack_conv(p["conv2_w"], p["conv2_b"], kp=256)   # K: 150 -> 256

    # fc1: absorb PyTorch's NCHW .view(-1, 400) flatten order AND the 16->128
    # channel padding of the (lane-dense) pooled conv2 output.
    w1 = p["fc1_w"].reshape(120, 16, 5, 5)            # (out, c, h, w); in = c*25 + h*5 + w
    w1 = jnp.transpose(w1, (2, 3, 1, 0))              # (h, w, c, out)
    w1 = jnp.pad(w1, ((0, 0), (0, 0), (0, LANES - 16), (0, LANES - 120)))
    w1 = w1.reshape(5 * 5 * LANES, LANES).astype(jnp.bfloat16)
    b1 = jnp.pad(p["fc1_b"], (0, LANES - 120)).reshape(1, LANES).astype(jnp.float32)

    w2 = jnp.pad(p["fc2_w"].T, ((0, LANES - 120), (0, LANES - 84))).astype(jnp.bfloat16)
    b2 = jnp.pad(p["fc2_b"], (0, LANES - 84)).reshape(1, LANES).astype(jnp.float32)
    w3 = jnp.pad(p["fc3_w"].T, ((0, LANES - 84), (0, LANES - 10))).astype(jnp.bfloat16)
    b3 = jnp.pad(p["fc3_b"], (0, LANES - 10)).reshape(1, LANES).astype(jnp.float32)

    return {"c1w": c1w, "c1b": c1b, "c2w": c2w, "c2b": c2b,
            "w1": w1, "b1": b1, "w2": w2, "b2": b2, "w3": w3, "b3": b3}


# ----------------------------------------------------------------------------
# Forward pass (mirrors Net.forward)
# ----------------------------------------------------------------------------
@jax.jit
def net_forward(x_nchw, packed):
    # NCHW (PyTorch) -> NHWC (kernel layout)
    x = jnp.transpose(x_nchw, (0, 2, 3, 1)).astype(jnp.float32)

    x = conv_relu_pool_pallas(x, packed["c1w"], packed["c1b"], k=5)           # (N,14,14,128) bf16
    x = conv_relu_pool_pallas(x[..., :6], packed["c2w"], packed["c2b"], k=5)  # (N,5,5,128)  bf16

    n = x.shape[0]
    # Flatten in (h, w, c_pad) order; the NCHW .view(-1,400) permutation and the
    # channel padding are baked into w1, so this reshape is free (contiguous).
    x = x.reshape(n, 5 * 5 * LANES)                                           # (N, 3200) bf16
    x = mlp_pallas(x, packed["w1"], packed["b1"], packed["w2"], packed["b2"],
                   packed["w3"], packed["b3"])                                # (N, 128) f32
    return x[:, :10]


if __name__ == "__main__":
    # The module's geometry implies 32x32 RGB inputs (conv1 5x5 -> pool ->
    # conv2 5x5 -> pool -> 16*5*5 flatten).  batch=2.
    x = jax.random.normal(jax.random.PRNGKey(0), (2, 3, 32, 32), dtype=jnp.float32)

    params = init_params(jax.random.PRNGKey(42))
    packed = prepare_params(params)

    out = net_forward(x, packed)
    out = jax.block_until_ready(out)
    assert out.shape == (2, 10), out.shape
    print("KERNEL_OK")
</pallas_src>

<mosaic_0001>
module attributes {stable_mosaic.version = 11 : i64} {
  func.func @_conv_pool_kernel(%arg0: i32, %arg1: memref<4x208x128xbf16, #tpu.memory_space<vmem>>, %arg2: memref<128x128xbf16, #tpu.memory_space<vmem>>, %arg3: memref<1x128xf32, #tpu.memory_space<vmem>>, %arg4: memref<208x128xbf16, #tpu.memory_space<vmem>>) attributes {dimension_semantics = [#tpu.dimension_semantics<parallel>], iteration_bounds = array<i64: 2>, scalar_prefetch = 0 : i64, scratch_operands = 0 : i64, tpu.core_type = #tpu.core_type<tc>, window_params = [{transform_indices = @transform_0, window_bounds = array<i64: 4, 208, 128>}, {pipeline_mode = #tpu.pipeline_mode<synchronous>, transform_indices = @transform_1, window_bounds = array<i64: 128, 128>}, {pipeline_mode = #tpu.pipeline_mode<synchronous>, transform_indices = @transform_2, window_bounds = array<i64: 1, 128>}, {transform_indices = @transform_3, window_bounds = array<i64: 208, 128>}]} {
    %c0 = arith.constant 0 : index
    %c0_0 = arith.constant 0 : index
    %c0_1 = arith.constant 0 : index
    %0 = vector.load %arg1[%c0, %c0_0, %c0_1] : memref<4x208x128xbf16, #tpu.memory_space<vmem>>, vector<4x208x128xbf16>
    %1 = vector.shape_cast %0 : vector<4x208x128xbf16> to vector<832x128xbf16>
    %c0_2 = arith.constant 0 : index
    %c0_3 = arith.constant 0 : index
    %2 = vector.load %arg2[%c0_2, %c0_3] : memref<128x128xbf16, #tpu.memory_space<vmem>>, vector<128x128xbf16>
    %cst = arith.constant dense<0.000000e+00> : vector<832x128xf32>
    %3 = tpu.matmul %1, %2, %cst {dimension_numbers = #tpu.dot_dimension_numbers<[1], [0], [0], [1], [0, 0, 1, 1], [], []>} : vector<832x128xbf16>, vector<128x128xbf16>, vector<832x128xf32> -> vector<832x128xf32>
    %4 = vector.shape_cast %3 : vector<832x128xf32> to vector<4x208x128xf32>
    %5 = vector.extract_strided_slice %4 {offsets = [0, 0, 0], sizes = [1, 208, 128], strides = [1, 1, 1]} : vector<4x208x128xf32> to vector<1x208x128xf32>
    %6 = vector.shape_cast %5 : vector<1x208x128xf32> to vector<208x128xf32>
    %7 = vector.extract_strided_slice %4 {offsets = [1, 0, 0], sizes = [1, 208, 128], strides = [1, 1, 1]} : vector<4x208x128xf32> to vector<1x208x128xf32>
    %8 = vector.shape_cast %7 : vector<1x208x128xf32> to vector<208x128xf32>
    %9 = arith.maximumf %6, %8 : vector<208x128xf32>
    %10 = vector.extract_strided_slice %4 {offsets = [2, 0, 0], sizes = [1, 208, 128], strides = [1, 1, 1]} : vector<4x208x128xf32> to vector<1x208x128xf32>
    %11 = vector.shape_cast %10 : vector<1x208x128xf32> to vector<208x128xf32>
    %12 = vector.extract_strided_slice %4 {offsets = [3, 0, 0], sizes = [1, 208, 128], strides = [1, 1, 1]} : vector<4x208x128xf32> to vector<1x208x128xf32>
    %13 = vector.shape_cast %12 : vector<1x208x128xf32> to vector<208x128xf32>
    %14 = arith.maximumf %11, %13 : vector<208x128xf32>
    %15 = arith.maximumf %9, %14 : vector<208x128xf32>
    %c0_4 = arith.constant 0 : index
    %c0_5 = arith.constant 0 : index
    %16 = vector.load %arg3[%c0_4, %c0_5] : memref<1x128xf32, #tpu.memory_space<vmem>>, vector<1x128xf32>
    %17 = vector.broadcast %16 : vector<1x128xf32> to vector<208x128xf32>
    %18 = arith.addf %15, %17 : vector<208x128xf32>
    %cst_6 = arith.constant 0.000000e+00 : f32
    %19 = vector.broadcast %cst_6 : f32 to vector<208x128xf32>
    %20 = arith.maximumf %18, %19 : vector<208x128xf32>
    %21 = arith.truncf %20 : vector<208x128xf32> to vector<208x128xbf16>
    %c0_7 = arith.constant 0 : index
    %c0_8 = arith.constant 0 : index
    %22 = vector.load %arg4[%c0_7, %c0_8] : memref<208x128xbf16, #tpu.memory_space<vmem>>, vector<208x128xbf16>
    tpu.vector_store %arg4[%c0_7, %c0_8], %21 {strides = array<i32>} : memref<208x128xbf16, #tpu.memory_space<vmem>>, vector<208x128xbf16>,
    return
  }
  func.func @transform_0(%arg0: i32) -> (i32, i32, i32) {
    %c0_i32 = arith.constant 0 : i32
    %c0_i32_0 = arith.constant 0 : i32
    %c0_i32_1 = arith.constant 0 : i32
    return %c0_i32, %arg0, %c0_i32_0 : i32, i32, i32
  }
  func.func @transform_1(%arg0: i32) -> (i32, i32) {
    %c0_i32 = arith.constant 0 : i32
    %c0_i32_0 = arith.constant 0 : i32
    %c0_i32_1 = arith.constant 0 : i32
    return %c0_i32, %c0_i32_0 : i32, i32
  }
  func.func @transform_2(%arg0: i32) -> (i32, i32) {
    %c0_i32 = arith.constant 0 : i32
    %c0_i32_0 = arith.constant 0 : i32
    %c0_i32_1 = arith.constant 0 : i32
    return %c0_i32, %c0_i32_0 : i32, i32
  }
  func.func @transform_3(%arg0: i32) -> (i32, i32) {
    %c0_i32 = arith.constant 0 : i32
    %c0_i32_0 = arith.constant 0 : i32
    return %arg0, %c0_i32 : i32, i32
  }
}

module attributes {stable_mosaic.version = 11 : i64} {
  func.func @_conv_pool_kernel(%arg0: i32, %arg1: memref<4x64x256xbf16, #tpu.memory_space<vmem>>, %arg2: memref<256x128xbf16, #tpu.memory_space<vmem>>, %arg3: memref<1x128xf32, #tpu.memory_space<vmem>>, %arg4: memref<64x128xbf16, #tpu.memory_space<vmem>>) attributes {dimension_semantics = [#tpu.dimension_semantics<parallel>], iteration_bounds = array<i64: 1>, scalar_prefetch = 0 : i64, scratch_operands = 0 : i64, tpu.core_type = #tpu.core_type<tc>, window_params = [{transform_indices = @transform_0, window_bounds = array<i64: 4, 64, 256>}, {pipeline_mode = #tpu.pipeline_mode<synchronous>, transform_indices = @transform_1, window_bounds = array<i64: 256, 128>}, {pipeline_mode = #tpu.pipeline_mode<synchronous>, transform_indices = @transform_2, window_bounds = array<i64: 1, 128>}, {transform_indices = @transform_3, window_bounds = array<i64: 64, 128>}]} {
    %c0 = arith.constant 0 : index
    %c0_0 = arith.constant 0 : index
    %c0_1 = arith.constant 0 : index
    %0 = vector.load %arg1[%c0, %c0_0, %c0_1] : memref<4x64x256xbf16, #tpu.memory_space<vmem>>, vector<4x64x256xbf16>
    %1 = vector.shape_cast %0 : vector<4x64x256xbf16> to vector<256x256xbf16>
    %c0_2 = arith.constant 0 : index
    %c0_3 = arith.constant 0 : index
    %2 = vector.load %arg2[%c0_2, %c0_3] : memref<256x128xbf16, #tpu.memory_space<vmem>>, vector<256x128xbf16>
    %cst = arith.constant dense<0.000000e+00> : vector<256x128xf32>
    %3 = tpu.matmul %1, %2, %cst {dimension_numbers = #tpu.dot_dimension_numbers<[1], [0], [0], [1], [0, 0, 1, 1], [], []>} : vector<256x256xbf16>, vector<256x128xbf16>, vector<256x128xf32> -> vector<256x128xf32>
    %4 = vector.shape_cast %3 : vector<256x128xf32> to vector<4x64x128xf32>
    %5 = vector.extract_strided_slice %4 {offsets = [0, 0, 0], sizes = [1, 64, 128], strides = [1, 1, 1]} : vector<4x64x128xf32> to vector<1x64x128xf32>
    %6 = vector.shape_cast %5 : vector<1x64x128xf32> to vector<64x128xf32>
    %7 = vector.extract_strided_slice %4 {offsets = [1, 0, 0], sizes = [1, 64, 128], strides = [1, 1, 1]} : vector<4x64x128xf32> to vector<1x64x128xf32>
    %8 = vector.shape_cast %7 : vector<1x64x128xf32> to vector<64x128xf32>
    %9 = arith.maximumf %6, %8 : vector<64x128xf32>
    %10 = vector.extract_strided_slice %4 {offsets = [2, 0, 0], sizes = [1, 64, 128], strides = [1, 1, 1]} : vector<4x64x128xf32> to vector<1x64x128xf32>
    %11 = vector.shape_cast %10 : vector<1x64x128xf32> to vector<64x128xf32>
    %12 = vector.extract_strided_slice %4 {offsets = [3, 0, 0], sizes = [1, 64, 128], strides = [1, 1, 1]} : vector<4x64x128xf32> to vector<1x64x128xf32>
    %13 = vector.shape_cast %12 : vector<1x64x128xf32> to vector<64x128xf32>
    %14 = arith.maximumf %11, %13 : vector<64x128xf32>
    %15 = arith.maximumf %9, %14 : vector<64x128xf32>
    %c0_4 = arith.constant 0 : index
    %c0_5 = arith.constant 0 : index
    %16 = vector.load %arg3[%c0_4, %c0_5] : memref<1x128xf32, #tpu.memory_space<vmem>>, vector<1x128xf32>
    %17 = vector.broadcast %16 : vector<1x128xf32> to vector<64x128xf32>
    %18 = arith.addf %15, %17 : vector<64x128xf32>
    %cst_6 = arith.constant 0.000000e+00 : f32
    %19 = vector.broadcast %cst_6 : f32 to vector<64x128xf32>
    %20 = arith.maximumf %18, %19 : vector<64x128xf32>
    %21 = arith.truncf %20 : vector<64x128xf32> to vector<64x128xbf16>
    %c0_7 = arith.constant 0 : index
    %c0_8 = arith.constant 0 : index
    %22 = vector.load %arg4[%c0_7, %c0_8] : memref<64x128xbf16, #tpu.memory_space<vmem>>, vector<64x128xbf16>
    tpu.vector_store %arg4[%c0_7, %c0_8], %21 {strides = array<i32>} : memref<64x128xbf16, #tpu.memory_space<vmem>>, vector<64x128xbf16>,
    return
  }
  func.func @transform_0(%arg0: i32) -> (i32, i32, i32) {
    %c0_i32 = arith.constant 0 : i32
    %c0_i32_0 = arith.constant 0 : i32
    %c0_i32_1 = arith.constant 0 : i32
    return %c0_i32, %arg0, %c0_i32_0 : i32, i32, i32
  }
  func.func @transform_1(%arg0: i32) -> (i32, i32) {
    %c0_i32 = arith.constant 0 : i32
    %c0_i32_0 = arith.constant 0 : i32
    %c0_i32_1 = arith.constant 0 : i32
    return %c0_i32, %c0_i32_0 : i32, i32
  }
  func.func @transform_2(%arg0: i32) -> (i32, i32) {
    %c0_i32 = arith.constant 0 : i32
    %c0_i32_0 = arith.constant 0 : i32
    %c0_i32_1 = arith.constant 0 : i32
    return %c0_i32, %c0_i32_0 : i32, i32
  }
  func.func @transform_3(%arg0: i32) -> (i32, i32) {
    %c0_i32 = arith.constant 0 : i32
    %c0_i32_0 = arith.constant 0 : i32
    return %arg0, %c0_i32 : i32, i32
  }
}

module attributes {stable_mosaic.version = 11 : i64} {
  func.func @_mlp_kernel(%arg0: i32, %arg1: memref<16x3200xbf16, #tpu.memory_space<vmem>>, %arg2: memref<3200x128xbf16, #tpu.memory_space<vmem>>, %arg3: memref<1x128xf32, #tpu.memory_space<vmem>>, %arg4: memref<128x128xbf16, #tpu.memory_space<vmem>>, %arg5: memref<1x128xf32, #tpu.memory_space<vmem>>, %arg6: memref<128x128xbf16, #tpu.memory_space<vmem>>, %arg7: memref<1x128xf32, #tpu.memory_space<vmem>>, %arg8: memref<16x128xf32, #tpu.memory_space<vmem>>) attributes {dimension_semantics = [#tpu.dimension_semantics<parallel>], iteration_bounds = array<i64: 1>, scalar_prefetch = 0 : i64, scratch_operands = 0 : i64, tpu.core_type = #tpu.core_type<tc>, window_params = [{transform_indices = @transform_0, window_bounds = array<i64: 16, 3200>}, {pipeline_mode = #tpu.pipeline_mode<synchronous>, transform_indices = @transform_1, window_bounds = array<i64: 3200, 128>}, {pipeline_mode = #tpu.pipeline_mode<synchronous>, transform_indices = @transform_2, window_bounds = array<i64: 1, 128>}, {pipeline_mode = #tpu.pipeline_mode<synchronous>, transform_indices = @transform_3, window_bounds = array<i64: 128, 128>}, {pipeline_mode = #tpu.pipeline_mode<synchronous>, transform_indices = @transform_4, window_bounds = array<i64: 1, 128>}, {pipeline_mode = #tpu.pipeline_mode<synchronous>, transform_indices = @transform_5, window_bounds = array<i64: 128, 128>}, {pipeline_mode = #tpu.pipeline_mode<synchronous>, transform_indices = @transform_6, window_bounds = array<i64: 1, 128>}, {transform_indices = @transform_7, window_bounds = array<i64: 16, 128>}]} {
    %c0 = arith.constant 0 : index
    %c0_0 = arith.constant 0 : index
    %0 = vector.load %arg1[%c0, %c0_0] : memref<16x3200xbf16, #tpu.memory_space<vmem>>, vector<16x3200xbf16>
    %c0_1 = arith.constant 0 : index
    %c0_2 = arith.constant 0 : index
    %1 = vector.load %arg2[%c0_1, %c0_2] : memref<3200x128xbf16, #tpu.memory_space<vmem>>, vector<3200x128xbf16>
    %cst = arith.constant dense<0.000000e+00> : vector<16x128xf32>
    %2 = tpu.matmul %0, %1, %cst {dimension_numbers = #tpu.dot_dimension_numbers<[1], [0], [0], [1], [0, 0, 1, 1], [], []>} : vector<16x3200xbf16>, vector<3200x128xbf16>, vector<16x128xf32> -> vector<16x128xf32>
    %c0_3 = arith.constant 0 : index
    %c0_4 = arith.constant 0 : index
    %3 = vector.load %arg3[%c0_3, %c0_4] : memref<1x128xf32, #tpu.memory_space<vmem>>, vector<1x128xf32>
    %4 = vector.broadcast %3 : vector<1x128xf32> to vector<16x128xf32>
    %5 = arith.addf %2, %4 : vector<16x128xf32>
    %cst_5 = arith.constant 0.000000e+00 : f32
    %6 = vector.broadcast %cst_5 : f32 to vector<16x128xf32>
    %7 = arith.maximumf %5, %6 : vector<16x128xf32>
    %8 = arith.truncf %7 : vector<16x128xf32> to vector<16x128xbf16>
    %c0_6 = arith.constant 0 : index
    %c0_7 = arith.constant 0 : index
    %9 = vector.load %arg4[%c0_6, %c0_7] : memref<128x128xbf16, #tpu.memory_space<vmem>>, vector<128x128xbf16>
    %cst_8 = arith.constant dense<0.000000e+00> : vector<16x128xf32>
    %10 = tpu.matmul %8, %9, %cst_8 {dimension_numbers = #tpu.dot_dimension_numbers<[1], [0], [0], [1], [0, 0, 1, 1], [], []>} : vector<16x128xbf16>, vector<128x128xbf16>, vector<16x128xf32> -> vector<16x128xf32>
    %c0_9 = arith.constant 0 : index
    %c0_10 = arith.constant 0 : index
    %11 = vector.load %arg5[%c0_9, %c0_10] : memref<1x128xf32, #tpu.memory_space<vmem>>, vector<1x128xf32>
    %12 = vector.broadcast %11 : vector<1x128xf32> to vector<16x128xf32>
    %13 = arith.addf %10, %12 : vector<16x128xf32>
    %cst_11 = arith.constant 0.000000e+00 : f32
    %14 = vector.broadcast %cst_11 : f32 to vector<16x128xf32>
    %15 = arith.maximumf %13, %14 : vector<16x128xf32>
    %16 = arith.truncf %15 : vector<16x128xf32> to vector<16x128xbf16>
    %c0_12 = arith.constant 0 : index
    %c0_13 = arith.constant 0 : index
    %17 = vector.load %arg6[%c0_12, %c0_13] : memref<128x128xbf16, #tpu.memory_space<vmem>>, vector<128x128xbf16>
    %cst_14 = arith.constant dense<0.000000e+00> : vector<16x128xf32>
    %18 = tpu.matmul %16, %17, %cst_14 {dimension_numbers = #tpu.dot_dimension_numbers<[1], [0], [0], [1], [0, 0, 1, 1], [], []>} : vector<16x128xbf16>, vector<128x128xbf16>, vector<16x128xf32> -> vector<16x128xf32>
    %c0_15 = arith.constant 0 : index
    %c0_16 = arith.constant 0 : index
    %19 = vector.load %arg7[%c0_15, %c0_16] : memref<1x128xf32, #tpu.memory_space<vmem>>, vector<1x128xf32>
    %20 = vector.broadcast %19 : vector<1x128xf32> to vector<16x128xf32>
    %21 = arith.addf %18, %20 : vector<16x128xf32>
    %c0_17 = arith.constant 0 : index
    %c0_18 = arith.constant 0 : index
    %22 = vector.load %arg8[%c0_17, %c0_18] : memref<16x128xf32, #tpu.memory_space<vmem>>, vector<16x128xf32>
    tpu.vector_store %arg8[%c0_17, %c0_18], %21 {strides = array<i32>} : memref<16x128xf32, #tpu.memory_space<vmem>>, vector<16x128xf32>,
    return
  }
  func.func @transform_0(%arg0: i32) -> (i32, i32) {
    %c0_i32 = arith.constant 0 : i32
    %c0_i32_0 = arith.constant 0 : i32
    return %arg0, %c0_i32 : i32, i32
  }
  func.func @transform_1(%arg0: i32) -> (i32, i32) {
    %c0_i32 = arith.constant 0 : i32
    %c0_i32_0 = arith.constant 0 : i32
    %c0_i32_1 = arith.constant 0 : i32
    return %c0_i32, %c0_i32_0 : i32, i32
  }
  func.func @transform_2(%arg0: i32) -> (i32, i32) {
    %c0_i32 = arith.constant 0 : i32
    %c0_i32_0 = arith.constant 0 : i32
    %c0_i32_1 = arith.constant 0 : i32
    return %c0_i32, %c0_i32_0 : i32, i32
  }
  func.func @transform_3(%arg0: i32) -> (i32, i32) {
    %c0_i32 = arith.constant 0 : i32
    %c0_i32_0 = arith.constant 0 : i32
    %c0_i32_1 = arith.constant 0 : i32
    return %c0_i32, %c0_i32_0 : i32, i32
  }
  func.func @transform_4(%arg0: i32) -> (i32, i32) {
    %c0_i32 = arith.constant 0 : i32
    %c0_i32_0 = arith.constant 0 : i32
    %c0_i32_1 = arith.constant 0 : i32
    return %c0_i32, %c0_i32_0 : i32, i32
  }
  func.func @transform_5(%arg0: i32) -> (i32, i32) {
    %c0_i32 = arith.constant 0 : i32
    %c0_i32_0 = arith.constant 0 : i32
    %c0_i32_1 = arith.constant 0 : i32
    return %c0_i32, %c0_i32_0 : i32, i32
  }
  func.func @transform_6(%arg0: i32) -> (i32, i32) {
    %c0_i32 = arith.constant 0 : i32
    %c0_i32_0 = arith.constant 0 : i32
    %c0_i32_1 = arith.constant 0 : i32
    return %c0_i32, %c0_i32_0 : i32, i32
  }
  func.func @transform_7(%arg0: i32) -> (i32, i32) {
    %c0_i32 = arith.constant 0 : i32
    %c0_i32_0 = arith.constant 0 : i32
    return %arg0, %c0_i32 : i32, i32
  }
}

</mosaic_0001>

<bundles_post_ra>
// kernel: net_forward.3
= control target key start
LH: loop header
LB: loop body
LE: loop exit
PB: predicated region body
PF: predicated region fallthrough
CT: control target
= control target key end

     0   :  { %s2108_s12 = smov 0   ;;  %s2110_s13 = smov 0   ;;  %s2392_s0 = inlined_call_operand.vmem [shape: bf16[4,416,128], index: 0, kind: input, shape index: {}]   ;;  %s2393_s1 = inlined_call_operand.vmem [shape: bf16[128,128], index: 1, kind: input, shape index: {}]   ;;  %s2394_s2 = inlined_call_operand.vmem [shape: f32[1,128], index: 2, kind: input, shape index: {}]   ;;  %s2395_s3 = inlined_call_operand.vmem [shape: bf16[416,128], index: 3, kind: output, shape index: {}]  }
   0x1   :  { %s2112_s14 = smov 0  }
   0x2 LB: > { %s1626_s15 = sadd.s32 4294967295, %s2086_s14   ;;  %s2125_s16 = sadd.s32 1, %s2086_s14   ;;  %s2086_s14 = sphi %s2112_s14, %s2398_s14   ;;  %s2082_s13 = sphi %s2110_s13, %s2397_s13   ;;  %s2078_s12 = sphi %s2108_s12, %s2396_s12  }
   0x3   : > { %s17_s17 = ssub.s32 %s2086_s14, %s2125_s16  ;;  %s20_s18 = sadd.s32 1, %s2082_s13 }
   0x4   : > { %p18_p0 = scmp.eq.s32.totalorder %s17_s17, 0  ;;  %p27_p1 = scmp.ne.s32.totalorder %s2082_s13, %s2078_s12 }
   0x5   : > { %p28_p2 = scmp.eq.s32.totalorder %s2086_s14, 0  ;;  %p1629_p4 = scmp.ge.s32.totalorder %s2086_s14, 2 }
   0x6   : > { %s2134_s19 = scalar_select %p18_p0, %s2082_s13, %s20_s18  }
   0x7   : > { %p29_p3 = por %p28_p2, %p27_p1  ;;  %127 = sbr.rel (%p1629_p4) target bundleno = 69 (0x45), region = 24 }
   0xc   : > { %130 = sbr.rel (!%p29_p3) target bundleno = 69 (0x45), region = 28  ;;  %s132_s20 = sand.u32 (%p29_p3), 1, %s2082_s13  }
   0xd   : > { %s1875_s21 = smul.u32 (%p29_p3), 104, %s2086_s14 }
   0xe   : > { %s2037_s22 = smul.u32 (%p29_p3), 416, %s132_s20 }
   0xf   : > { %s2142_s25 = scalar_lea.vmem (%p29_p3), %s2392_s0, %s1875_s21 }
  0x10   : > { %v154_v0 = vld [vmem:[%s2142_s25] sm:$0xff] (%p29_p3)   ;;  %v158_v1 = vld [vmem:[%s2142_s25 + $0x8] sm:$0xff] (%p29_p3)   ;;  %v162_v2 = vld [vmem:[%s2142_s25 + $0x10] sm:$0xff] (%p29_p3)   ;;  %s2147_s26 = scalar_lea.vmem (%p29_p3), [#allocation2], %s2037_s22 }
  0x11   : > { %155 = vst [vmem:[%s2147_s26] sm:$0xff] %v154_v0   ;;  %v166_v3 = vld [vmem:[%s2142_s25 + $0x18] sm:$0xff]   ;;  %v170_v4 = vld [vmem:[%s2142_s25 + $0x20] sm:$0xff]   ;;  %v174_v5 = vld [vmem:[%s2142_s25 + $0x28] sm:$0xff]  }
  0x12   : > { %159 = vst [vmem:[%s2147_s26 + $0x8] sm:$0xff] %v158_v1   ;;  %v178_v6 = vld [vmem:[%s2142_s25 + $0x30] sm:$0xff]   ;;  %v182_v7 = vld [vmem:[%s2142_s25 + $0x38] sm:$0xff]   ;;  %v186_v8 = vld [vmem:[%s2142_s25 + $0x40] sm:$0xff]  }
  0x13   : > { %163 = vst [vmem:[%s2147_s26 + $0x10] sm:$0xff] %v162_v2   ;;  %v190_v9 = vld [vmem:[%s2142_s25 + $0x48] sm:$0xff]   ;;  %v194_v10 = vld [vmem:[%s2142_s25 + $0x50] sm:$0xff]   ;;  %v198_v11 = vld [vmem:[%s2142_s25 + $0x58] sm:$0xff]  }
  0x14   : > { %167 = vst [vmem:[%s2147_s26 + $0x18] sm:$0xff] %v166_v3   ;;  %v202_v12 = vld [vmem:[%s2142_s25 + $0x60] sm:$0xff]   ;;  %v206_v13 = vld [vmem:[%s2142_s25 + $0xd0] sm:$0xff]   ;;  %v210_v14 = vld [vmem:[%s2142_s25 + $0xd8] sm:$0xff]  }
  0x15   : > { %171 = vst [vmem:[%s2147_s26 + $0x20] sm:$0xff] %v170_v4   ;;  %v214_v15 = vld [vmem:[%s2142_s25 + $0xe0] sm:$0xff]   ;;  %v218_v16 = vld [vmem:[%s2142_s25 + $0xe8] sm:$0xff]   ;;  %v222_v17 = vld [vmem:[%s2142_s25 + $0xf0] sm:$0xff]  }
  0x16   : > { %175 = vst [vmem:[%s2147_s26 + $0x28] sm:$0xff] %v174_v5   ;;  %v226_v18 = vld [vmem:[%s2142_s25 + $0xf8] sm:$0xff]   ;;  %v230_v19 = vld [vmem:[%s2142_s25 + $0x100] sm:$0xff]   ;;  %v234_v20 = vld [vmem:[%s2142_s25 + $0x108] sm:$0xff]  }
  0x17   : > { %179 = vst [vmem:[%s2147_s26 + $0x30] sm:$0xff] %v178_v6   ;;  %v238_v21 = vld [vmem:[%s2142_s25 + $0x110] sm:$0xff]   ;;  %v242_v22 = vld [vmem:[%s2142_s25 + $0x118] sm:$0xff]   ;;  %v246_v23 = vld [vmem:[%s2142_s25 + $0x120] sm:$0xff]  }
  0x18   : > { %183 = vst [vmem:[%s2147_s26 + $0x38] sm:$0xff] %v182_v7   ;;  %v250_v24 = vld [vmem:[%s2142_s25 + $0x128] sm:$0xff]   ;;  %v254_v25 = vld [vmem:[%s2142_s25 + $0x130] sm:$0xff]   ;;  %v258_v26 = vld [vmem:[%s2142_s25 + $0x1a0] sm:$0xff]  }
  0x19   : > { %187 = vst [vmem:[%s2147_s26 + $0x40] sm:$0xff] %v186_v8   ;;  %v262_v27 = vld [vmem:[%s2142_s25 + $0x1a8] sm:$0xff]   ;;  %v266_v28 = vld [vmem:[%s2142_s25 + $0x1b0] sm:$0xff]   ;;  %v270_v29 = vld [vmem:[%s2142_s25 + $0x1b8] sm:$0xff]  }
  0x1a   : > { %191 = vst [vmem:[%s2147_s26 + $0x48] sm:$0xff] %v190_v9   ;;  %v274_v30 = vld [vmem:[%s2142_s25 + $0x1c0] sm:$0xff]   ;;  %v278_v31 = vld [vmem:[%s2142_s25 + $0x1c8] sm:$0xff]   ;;  %v282_v32 = vld [vmem:[%s2142_s25 + $0x1d0] sm:$0xff]  }
  0x1b   : > { %195 = vst [vmem:[%s2147_s26 + $0x50] sm:$0xff] %v194_v10   ;;  %v286_v33 = vld [vmem:[%s2142_s25 + $0x1d8] sm:$0xff]   ;;  %v290_v34 = vld [vmem:[%s2142_s25 + $0x1e0] sm:$0xff]   ;;  %v294_v35 = vld [vmem:[%s2142_s25 + $0x1e8] sm:$0xff]  }
  0x1c   : > { %199 = vst [vmem:[%s2147_s26 + $0x58] sm:$0xff] %v198_v11   ;;  %v298_v36 = vld [vmem:[%s2142_s25 + $0x1f0] sm:$0xff]   ;;  %v302_v37 = vld [vmem:[%s2142_s25 + $0x1f8] sm:$0xff]   ;;  %v306_v38 = vld [vmem:[%s2142_s25 + $0x200] sm:$0xff]  }
  0x1d   : > { %203 = vst [vmem:[%s2147_s26 + $0x60] sm:$0xff] %v202_v12   ;;  %v310_v39 = vld [vmem:[%s2142_s25 + $0x270] sm:$0xff]   ;;  %v314_v40 = vld [vmem:[%s2142_s25 + $0x278] sm:$0xff]   ;;  %v318_v41 = vld [vmem:[%s2142_s25 + $0x280] sm:$0xff]  }
  0x1e   : > { %207 = vst [vmem:[%s2147_s26 + $0x68] sm:$0xff] %v206_v13   ;;  %v322_v42 = vld [vmem:[%s2142_s25 + $0x288] sm:$0xff]   ;;  %v326_v43 = vld [vmem:[%s2142_s25 + $0x290] sm:$0xff]   ;;  %v330_v44 = vld [vmem:[%s2142_s25 + $0x298] sm:$0xff]  }
  0x1f   : > { %211 = vst [vmem:[%s2147_s26 + $0x70] sm:$0xff] %v210_v14   ;;  %v334_v45 = vld [vmem:[%s2142_s25 + $0x2a0] sm:$0xff]   ;;  %v338_v46 = vld [vmem:[%s2142_s25 + $0x2a8] sm:$0xff]   ;;  %v342_v47 = vld [vmem:[%s2142_s25 + $0x2b0] sm:$0xff]  }
  0x20   : > { %215 = vst [vmem:[%s2147_s26 + $0x78] sm:$0xff] %v214_v15   ;;  %v346_v48 = vld [vmem:[%s2142_s25 + $0x2b8] sm:$0xff]   ;;  %v350_v49 = vld [vmem:[%s2142_s25 + $0x2c0] sm:$0xff]   ;;  %v354_v50 = vld [vmem:[%s2142_s25 + $0x2c8] sm:$0xff]  }
  0x21   : > { %219 = vst [vmem:[%s2147_s26 + $0x80] sm:$0xff] %v218_v16   ;;  %v358_v51 = vld [vmem:[%s2142_s25 + $0x2d0] sm:$0xff]  }
  0x22   : > { %223 = vst [vmem:[%s2147_s26 + $0x88] sm:$0xff] %v222_v17  }
  0x23   : > { %227 = vst [vmem:[%s2147_s26 + $0x90] sm:$0xff] %v226_v18  }
  0x24   : > { %231 = vst [vmem:[%s2147_s26 + $0x98] sm:$0xff] %v230_v19  }
  0x25   : > { %235 = vst [vmem:[%s2147_s26 + $0xa0] sm:$0xff] %v234_v20  }
  0x26   : > { %239 = vst [vmem:[%s2147_s26 + $0xa8] sm:$0xff] %v238_v21  }
  0x27   : > { %243 = vst [vmem:[%s2147_s26 + $0xb0] sm:$0xff] %v242_v22  }
  0x28   : > { %247 = vst [vmem:[%s2147_s26 + $0xb8] sm:$0xff] %v246_v23  }
  0x29   : > { %251 = vst [vmem:[%s2147_s26 + $0xc0] sm:$0xff] %v250_v24  }
  0x2a   : > { %255 = vst [vmem:[%s2147_s26 + $0xc8] sm:$0xff] %v254_v25  }
  0x2b   : > { %259 = vst [vmem:[%s2147_s26 + $0xd0] sm:$0xff] %v258_v26  }
  0x2c   : > { %263 = vst [vmem:[%s2147_s26 + $0xd8] sm:$0xff] %v262_v27  }
  0x2d   : > { %267 = vst [vmem:[%s2147_s26 + $0xe0] sm:$0xff] %v266_v28  }
  0x2e   : > { %271 = vst [vmem:[%s2147_s26 + $0xe8] sm:$0xff] %v270_v29  }
  0x2f   : > { %275 = vst [vmem:[%s2147_s26 + $0xf0] sm:$0xff] %v274_v30  }
  0x30   : > { %279 = vst [vmem:[%s2147_s26 + $0xf8] sm:$0xff] %v278_v31  }
  0x31   : > { %283 = vst [vmem:[%s2147_s26 + $0x100] sm:$0xff] %v282_v32  }
  0x32   : > { %287 = vst [vmem:[%s2147_s26 + $0x108] sm:$0xff] %v286_v33  }
  0x33   : > { %291 = vst [vmem:[%s2147_s26 + $0x110] sm:$0xff] %v290_v34  }
  0x34   : > { %295 = vst [vmem:[%s2147_s26 + $0x118] sm:$0xff] %v294_v35  }
  0x35   : > { %299 = vst [vmem:[%s2147_s26 + $0x120] sm:$0xff] %v298_v36  }
  0x36   : > { %303 = vst [vmem:[%s2147_s26 + $0x128] sm:$0xff] %v302_v37  }
  0x37   : > { %307 = vst [vmem:[%s2147_s26 + $0x130] sm:$0xff] %v306_v38  }
  0x38   : > { %311 = vst [vmem:[%s2147_s26 + $0x138] sm:$0xff] %v310_v39  }
  0x39   : > { %315 = vst [vmem:[%s2147_s26 + $0x140] sm:$0xff] %v314_v40  }
  0x3a   : > { %319 = vst [vmem:[%s2147_s26 + $0x148] sm:$0xff] %v318_v41  }
  0x3b   : > { %323 = vst [vmem:[%s2147_s26 + $0x150] sm:$0xff] %v322_v42  }
  0x3c   : > { %327 = vst [vmem:[%s2147_s26 + $0x158] sm:$0xff] %v326_v43  }
  0x3d   : > { %331 = vst [vmem:[%s2147_s26 + $0x160] sm:$0xff] %v330_v44  }
  0x3e   : > { %335 = vst [vmem:[%s2147_s26 + $0x168] sm:$0xff] %v334_v45  }
  0x3f   : > { %339 = vst [vmem:[%s2147_s26 + $0x170] sm:$0xff] %v338_v46  }
  0x40   : > { %343 = vst [vmem:[%s2147_s26 + $0x178] sm:$0xff] %v342_v47  }
  0x41   : > { %347 = vst [vmem:[%s2147_s26 + $0x180] sm:$0xff] %v346_v48  }
  0x42   : > { %351 = vst [vmem:[%s2147_s26 + $0x188] sm:$0xff] %v350_v49  }
  0x43   : > { %355 = vst [vmem:[%s2147_s26 + $0x190] sm:$0xff] %v354_v50  }
  0x44   : > { %359 = vst [vmem:[%s2147_s26 + $0x198] sm:$0xff] %v358_v51  }
  0x45 PF: > { %p1631_p5 = scmp.ge.s32.totalorder %s2086_s14, 1  ;;  %p592_p6 = scmp.lt.s32.totalorder %s2086_s14, 3 }
  0x47   : > { %p593_p7 = pnand %p1631_p5, %p592_p6 }
  0x48   : > { %s599_s17 = sand.u32 (!%p593_p7), 1, %s2078_s12   ;;  %s623_s12 = smul.u32 (!%p593_p7), 26, %s1626_s15 }
  0x49   : > { %596 = sbr.rel (%p593_p7) target bundleno = 454 (0x1c6), region = 69 }
  0x4a   : > { %s2038_s21 = smul.u32 (!%p593_p7), 416, %s599_s17  ;;  %p624_p8 = scmp.lt.s32.totalorder (!%p593_p7), %s623_s12, 51 }
  0x4c   : > { %s2277_s24 = scalar_lea.vmem (!%p593_p7), [#allocation2], %s2038_s21 }
  0x4e   : > { %v1935_v52 = vld [vmem:[%s2393_s1 + $0x38] sm:$0xff]  ;;  %v1934_v53 = vld [vmem:[%s2393_s1 + $0x30] sm:$0xff]  ;;  %v1933_v54 = vld [vmem:[%s2393_s1 + $0x28] sm:$0xff]  ;;  %s2400_s12 = smov (!%p624_p8, %s623_s12), 51 }
  0x4f   : > { %1109 = vmatpush.bf16.msra.mxu0 %v1935_v52  ;;  %2013 = vmatpush.bf16.msra.mxu1 %v1935_v52  ;;  %v1932_v55 = vld [vmem:[%s2393_s1 + $0x20] sm:$0xff]  ;;  %v1931_v56 = vld [vmem:[%s2393_s1 + $0x18] sm:$0xff]  ;;  %v1930_v57 = vld [vmem:[%s2393_s1 + $0x10] sm:$0xff]  ;;  %s1632_s14 = sshll.u32 %s2400_s12, 2 }
  0x50   : > { %2014 = vmatpush.bf16.msra.mxu2 %v1935_v52  ;;  %2015 = vmatpush.bf16.msra.mxu3 %v1935_v52  ;;  %v1929_v58 = vld [vmem:[%s2393_s1 + $0x8] sm:$0xff]  ;;  %v1928_v59 = vld [vmem:[%s2393_s1] sm:$0xff]  ;;  %v1902_v62 = vld [vmem:[%s2277_s24 + $0xd0] sm:$0xff]  ;;  %s2331_s28 = scalar_lea.vmem %s2395_s3, %s1632_s14 }
  0x51   : > { %v1876_v60 = vld [vmem:[%s2277_s24] sm:$0xff]  ;;  %v1889_v61 = vld [vmem:[%s2277_s24 + $0x68] sm:$0xff]  ;;  %v1915_v63 = vld [vmem:[%s2277_s24 + $0x138] sm:$0xff] }
  0x52   : > { %v1877_v0 = vld [vmem:[%s2277_s24 + $0x8] sm:$0xff]  ;;  %v1890_v1 = vld [vmem:[%s2277_s24 + $0x70] sm:$0xff]  ;;  %v1903_v2 = vld [vmem:[%s2277_s24 + $0xd8] sm:$0xff] }
  0x53   : > { %1110 = vmatpush.bf16.msra.mxu0 %v1934_v53  ;;  %2016 = vmatpush.bf16.msra.mxu1 %v1934_v53  ;;  %v1916_v3 = vld [vmem:[%s2277_s24 + $0x140] sm:$0xff]  ;;  %v1878_v4 = vld [vmem:[%s2277_s24 + $0x10] sm:$0xff]  ;;  %v1891_v5 = vld [vmem:[%s2277_s24 + $0x78] sm:$0xff] }
  0x54   : > { %2017 = vmatpush.bf16.msra.mxu2 %v1934_v53  ;;  %2018 = vmatpush.bf16.msra.mxu3 %v1934_v53  ;;  %v1904_v6 = vld [vmem:[%s2277_s24 + $0xe0] sm:$0xff]  ;;  %v1917_v7 = vld [vmem:[%s2277_s24 + $0x148] sm:$0xff]  ;;  %v1879_v8 = vld [vmem:[%s2277_s24 + $0x18] sm:$0xff] }
  0x55   : > { %v1892_v9 = vld [vmem:[%s2277_s24 + $0x80] sm:$0xff]  ;;  %v1905_v10 = vld [vmem:[%s2277_s24 + $0xe8] sm:$0xff]  ;;  %v1918_v11 = vld [vmem:[%s2277_s24 + $0x150] sm:$0xff] }
  0x56   : > { %v1880_v12 = vld [vmem:[%s2277_s24 + $0x20] sm:$0xff]  ;;  %v1893_v13 = vld [vmem:[%s2277_s24 + $0x88] sm:$0xff]  ;;  %v1906_v14 = vld [vmem:[%s2277_s24 + $0xf0] sm:$0xff] }
  0x57   : > { %1111 = vmatpush.bf16.msra.mxu0 %v1933_v54  ;;  %2019 = vmatpush.bf16.msra.mxu1 %v1933_v54  ;;  %v1919_v15 = vld [vmem:[%s2277_s24 + $0x158] sm:$0xff]  ;;  %v1881_v16 = vld [vmem:[%s2277_s24 + $0x28] sm:$0xff]  ;;  %v1894_v17 = vld [vmem:[%s2277_s24 + $0x90] sm:$0xff] }
  0x58   : > { %2020 = vmatpush.bf16.msra.mxu2 %v1933_v54  ;;  %2021 = vmatpush.bf16.msra.mxu3 %v1933_v54  ;;  %v1907_v18 = vld [vmem:[%s2277_s24 + $0xf8] sm:$0xff]  ;;  %v1920_v19 = vld [vmem:[%s2277_s24 + $0x160] sm:$0xff]  ;;  %v1882_v20 = vld [vmem:[%s2277_s24 + $0x30] sm:$0xff] }
  0x59   : > { %v1895_v21 = vld [vmem:[%s2277_s24 + $0x98] sm:$0xff]  ;;  %v1908_v22 = vld [vmem:[%s2277_s24 + $0x100] sm:$0xff]  ;;  %v1921_v23 = vld [vmem:[%s2277_s24 + $0x168] sm:$0xff] }
  0x5a   : > { %v1883_v24 = vld [vmem:[%s2277_s24 + $0x38] sm:$0xff]  ;;  %v1896_v25 = vld [vmem:[%s2277_s24 + $0xa0] sm:$0xff]  ;;  %v1909_v26 = vld [vmem:[%s2277_s24 + $0x108] sm:$0xff] }
  0x5b   : > { %1112 = vmatpush.bf16.msra.mxu0 %v1932_v55  ;;  %2022 = vmatpush.bf16.msra.mxu1 %v1932_v55  ;;  %v1922_v27 = vld [vmem:[%s2277_s24 + $0x170] sm:$0xff]  ;;  %v1884_v28 = vld [vmem:[%s2277_s24 + $0x40] sm:$0xff]  ;;  %v1897_v29 = vld [vmem:[%s2277_s24 + $0xa8] sm:$0xff] }
  0x5c   : > { %2023 = vmatpush.bf16.msra.mxu2 %v1932_v55  ;;  %2024 = vmatpush.bf16.msra.mxu3 %v1932_v55  ;;  %v1910_v32 = vld [vmem:[%s2277_s24 + $0x110] sm:$0xff]  ;;  %v1923_v33 = vld [vmem:[%s2277_s24 + $0x178] sm:$0xff]  ;;  %v2320_v41 = vld [vmem:[%s2394_s2] ss:$0 sm:$0xff] }
  0x5d   : > { %v1885_v44 = vld [vmem:[%s2277_s24 + $0x48] sm:$0xff]  ;;  %v1898_v45 = vld [vmem:[%s2277_s24 + $0xb0] sm:$0xff]  ;;  %v1911_v50 = vld [vmem:[%s2277_s24 + $0x118] sm:$0xff] }
  0x5e   : > { %v1924_v51 = vld [vmem:[%s2277_s24 + $0x180] sm:$0xff] }
  0x5f   : > { %1113 = vmatpush.bf16.msra.mxu0 %v1931_v56  ;;  %2025 = vmatpush.bf16.msra.mxu1 %v1931_v56 }
  0x60   : > { %2026 = vmatpush.bf16.msra.mxu2 %v1931_v56  ;;  %2027 = vmatpush.bf16.msra.mxu3 %v1931_v56 }
  0x63   : > { %1114 = vmatpush.bf16.msra.mxu0 %v1930_v57  ;;  %2028 = vmatpush.bf16.msra.mxu1 %v1930_v57 }
  0x64   : > { %2029 = vmatpush.bf16.msra.mxu2 %v1930_v57  ;;  %2030 = vmatpush.bf16.msra.mxu3 %v1930_v57 }
  0x67   : > { %1115 = vmatpush.bf16.msra.mxu0 %v1929_v58  ;;  %2031 = vmatpush.bf16.msra.mxu1 %v1929_v58 }
  0x68   : > { %2032 = vmatpush.bf16.msra.mxu2 %v1929_v58  ;;  %2033 = vmatpush.bf16.msra.mxu3 %v1929_v58 }
  0x6b   : > { %1116 = vmatpush.bf16.msra.mxu0 %v1928_v59  ;;  %2034 = vmatpush.bf16.msra.mxu1 %v1928_v59 }
  0x6c   : > { %2035 = vmatpush.bf16.msra.mxu2 %v1928_v59  ;;  %2036 = vmatpush.bf16.msra.mxu3 %v1928_v59 }
  0x6e   : > { %1117 = vmatmul.bf16.vlgmr.msra.gmra.mxu0 %v1876_v60  ;;  %1182 = vmatmul.bf16.vlgmr.msra.gmra.mxu1 %v1889_v61 }
  0x6f   : > { %1247 = vmatmul.bf16.vlgmr.msra.gmra.mxu2 %v1902_v62  ;;  %1312 = vmatmul.bf16.vlgmr.msra.gmra.mxu3 %v1915_v63 }
  0x7e   : > { %1122 = vmatmul.bf16.gmra.mxu0 %v1877_v0  ;;  %1187 = vmatmul.bf16.gmra.mxu1 %v1890_v1 }
  0x7f   : > { %1252 = vmatmul.bf16.gmra.mxu2 %v1903_v2  ;;  %1317 = vmatmul.bf16.gmra.mxu3 %v1916_v3  ;;  %v1886_v3 = vld [vmem:[%s2277_s24 + $0x50] sm:$0xff] }
  0x8e   : > { %1127 = vmatmul.bf16.gmra.mxu0 %v1878_v4  ;;  %1192 = vmatmul.bf16.gmra.mxu1 %v1891_v5  ;;  %v1899_v4 = vld [vmem:[%s2277_s24 + $0xb8] sm:$0xff] }
  0x8f   : > { %1257 = vmatmul.bf16.gmra.mxu2 %v1904_v6  ;;  %1322 = vmatmul.bf16.gmra.mxu3 %v1917_v7 }
  0x9e   : > { %1132 = vmatmul.bf16.gmra.mxu0 %v1879_v8  ;;  %1197 = vmatmul.bf16.gmra.mxu1 %v1892_v9  ;;  %v1912_v9 = vld [vmem:[%s2277_s24 + $0x120] sm:$0xff] }
  0x9f   : > { %1262 = vmatmul.bf16.gmra.mxu2 %v1905_v10  ;;  %1327 = vmatmul.bf16.gmra.mxu3 %v1918_v11  ;;  %v1925_v10 = vld [vmem:[%s2277_s24 + $0x188] sm:$0xff] }
  0xae   : > { %1137 = vmatmul.bf16.gmra.mxu0 %v1880_v12  ;;  %1202 = vmatmul.bf16.gmra.mxu1 %v1893_v13 }
  0xaf   : > { %1267 = vmatmul.bf16.gmra.mxu2 %v1906_v14  ;;  %1332 = vmatmul.bf16.gmra.mxu3 %v1919_v15 }
  0xbe   : > { %1142 = vmatmul.bf16.gmra.mxu0 %v1881_v16  ;;  %1207 = vmatmul.bf16.gmra.mxu1 %v1894_v17 }
  0xbf   : > { %1272 = vmatmul.bf16.gmra.mxu2 %v1907_v18  ;;  %1337 = vmatmul.bf16.gmra.mxu3 %v1920_v19 }
  0xce   : > { %1147 = vmatmul.bf16.gmra.mxu0 %v1882_v20  ;;  %1212 = vmatmul.bf16.gmra.mxu1 %v1895_v21 }
  0xcf   : > { %1277 = vmatmul.bf16.gmra.mxu2 %v1908_v22  ;;  %1342 = vmatmul.bf16.gmra.mxu3 %v1921_v23 }
  0xde   : > { %1152 = vmatmul.bf16.gmra.mxu0 %v1883_v24  ;;  %1217 = vmatmul.bf16.gmra.mxu1 %v1896_v25 }
  0xdf   : > { %1282 = vmatmul.bf16.gmra.mxu2 %v1909_v26  ;;  %1347 = vmatmul.bf16.gmra.mxu3 %v1922_v27  ;;  %v1887_v26 = vld [vmem:[%s2277_s24 + $0x58] sm:$0xff]  ;;  %v1900_v27 = vld [vmem:[%s2277_s24 + $0xc0] sm:$0xff] }
  0xeb   : > { %v1118_v30 = vpop.f32.mrf.mxu0  ;;  %v1183_v31 = vpop.f32.mrf.mxu1 }
  0xec   : > { %v1378_v38 = vmax.f32 %v1118_v30, %v1183_v31 }
  0xee   : > { %1157 = vmatmul.bf16.gmra.mxu0 %v1884_v28  ;;  %1222 = vmatmul.bf16.gmra.mxu1 %v1897_v29 }
  0xef   : > { %1287 = vmatmul.bf16.gmra.mxu2 %v1910_v32  ;;  %1352 = vmatmul.bf16.gmra.mxu3 %v1923_v33  ;;  %v1913_v32 = vld [vmem:[%s2277_s24 + $0x128] sm:$0xff]  ;;  %v1926_v33 = vld [vmem:[%s2277_s24 + $0x190] sm:$0xff] }
  0xf2   : > { %v1248_v34 = vpop.f32.mrf.mxu2  ;;  %v1313_v35 = vpop.f32.mrf.mxu3 }
  0xf3   : > { %v1120_v36 = vpop.f32.mrf.mxu0  ;;  %v1185_v37 = vpop.f32.mrf.mxu1  ;;  %v1404_v39 = vmax.f32 %v1248_v34, %v1313_v35 }
  0xf4   : > { %v1379_v46 = vmax.f32 %v1120_v36, %v1185_v37 }
  0xf5   : > { %v1430_v40 = vmax.f32 %v1378_v38, %v1404_v39 }
  0xf7   : > { %v1460_v52 = vadd.f32 %v2320_v41, %v1430_v40 }
  0xf9   : > { %v1486_v55 = vmax.f32 %v1460_v52, 0.0 }
  0xfa   : > { %v1250_v42 = vpop.f32.mrf.mxu2  ;;  %v1315_v43 = vpop.f32.mrf.mxu3 }
  0xfb   : > { %v1405_v47 = vmax.f32 %v1250_v42, %v1315_v43  ;;  %v1123_v48 = vpop.f32.mrf.mxu0  ;;  %v1188_v49 = vpop.f32.mrf.mxu1 }
  0xfc   : > { %v1380_v62 = vmax.f32 %v1123_v48, %v1188_v49 }
  0xfd   : > { %v1431_v53 = vmax.f32 %v1379_v46, %v1405_v47 }
  0xfe   : > { %1162 = vmatmul.bf16.gmra.mxu0 %v1885_v44  ;;  %1227 = vmatmul.bf16.gmra.mxu1 %v1898_v45 }
  0xff   : > { %v1461_v54 = vadd.f32 %v2320_v41, %v1431_v53  ;;  %1292 = vmatmul.bf16.gmra.mxu2 %v1911_v50  ;;  %1357 = vmatmul.bf16.gmra.mxu3 %v1924_v51  ;;  %v1888_v50 = vld [vmem:[%s2277_s24 + $0x60] sm:$0xff]  ;;  %v1901_v51 = vld [vmem:[%s2277_s24 + $0xc8] sm:$0xff] }
 0x101   : > { %v1487_v56 = vmax.f32 %v1461_v54, 0.0 }
 0x102   : > { %v1253_v57 = vpop.f32.mrf.mxu2  ;;  %v1318_v58 = vpop.f32.mrf.mxu3 }
 0x103   : > { %v1939_v59 = vpack.c.bf16 %v1487_v56, %v1486_v55  ;;  %v1125_v60 = vpop.f32.mrf.mxu0  ;;  %v1190_v61 = vpop.f32.mrf.mxu1  ;;  %v1406_v63 = vmax.f32 %v1253_v57, %v1318_v58  ;;  %v1914_v56 = vld [vmem:[%s2277_s24 + $0x130] sm:$0xff]  ;;  %v1927_v57 = vld [vmem:[%s2277_s24 + $0x198] sm:$0xff] }
 0x104   : > { %v1381_v5 = vmax.f32 %v1125_v60, %v1190_v61 }
 0x105   : > { %1940 = vst [vmem:[%s2331_s28] sm:$0xff] %v1939_v59   ;;  %v1432_v0 = vmax.f32 %v1380_v62, %v1406_v63 }
 0x107   : > { %v1462_v11 = vadd.f32 %v2320_v41, %v1432_v0 }
 0x109   : > { %v1488_v14 = vmax.f32 %v1462_v11, 0.0 }
 0x10a   : > { %v1255_v1 = vpop.f32.mrf.mxu2  ;;  %v1320_v2 = vpop.f32.mrf.mxu3 }
 0x10b   : > { %v1407_v6 = vmax.f32 %v1255_v1, %v1320_v2  ;;  %v1128_v7 = vpop.f32.mrf.mxu0  ;;  %v1193_v8 = vpop.f32.mrf.mxu1 }
 0x10c   : > { %v1382_v21 = vmax.f32 %v1128_v7, %v1193_v8 }
 0x10d   : > { %v1433_v12 = vmax.f32 %v1381_v5, %v1407_v6 }
 0x10e   : > { %1167 = vmatmul.bf16.gmra.mxu0 %v1886_v3  ;;  %1232 = vmatmul.bf16.gmra.mxu1 %v1899_v4 }
 0x10f   : > { %v1463_v13 = vadd.f32 %v2320_v41, %v1433_v12  ;;  %1297 = vmatmul.bf16.gmra.mxu2 %v1912_v9  ;;  %1362 = vmatmul.bf16.gmra.mxu3 %v1925_v10 }
 0x111   : > { %v1489_v15 = vmax.f32 %v1463_v13, 0.0 }
 0x112   : > { %v1258_v16 = vpop.f32.mrf.mxu2  ;;  %v1323_v17 = vpop.f32.mrf.mxu3 }
 0x113   : > { %v1944_v18 = vpack.c.bf16 %v1489_v15, %v1488_v14  ;;  %v1130_v19 = vpop.f32.mrf.mxu0  ;;  %v1195_v20 = vpop.f32.mrf.mxu1  ;;  %v1408_v22 = vmax.f32 %v1258_v16, %v1323_v17 }
 0x114   : > { %v1383_v28 = vmax.f32 %v1130_v19, %v1195_v20 }
 0x115   : > { %2001 = vst [vmem:[%s2331_s28 + $0x8] sm:$0xff] %v1944_v18   ;;  %v1434_v23 = vmax.f32 %v1382_v21, %v1408_v22 }
 0x117   : > { %v1464_v34 = vadd.f32 %v2320_v41, %v1434_v23 }
 0x119   : > { %v1490_v37 = vmax.f32 %v1464_v34, 0.0 }
 0x11a   : > { %v1260_v24 = vpop.f32.mrf.mxu2  ;;  %v1325_v25 = vpop.f32.mrf.mxu3 }
 0x11b   : > { %v1409_v29 = vmax.f32 %v1260_v24, %v1325_v25  ;;  %v1133_v30 = vpop.f32.mrf.mxu0  ;;  %v1198_v31 = vpop.f32.mrf.mxu1 }
 0x11c   : > { %v1384_v45 = vmax.f32 %v1133_v30, %v1198_v31 }
 0x11d   : > { %v1435_v35 = vmax.f32 %v1383_v28, %v1409_v29 }
 0x11e   : > { %1172 = vmatmul.bf16.gmra.mxu0 %v1887_v26  ;;  %1237 = vmatmul.bf16.gmra.mxu1 %v1900_v27 }
 0x11f   : > { %v1465_v36 = vadd.f32 %v2320_v41, %v1435_v35  ;;  %1302 = vmatmul.bf16.gmra.mxu2 %v1913_v32  ;;  %1367 = vmatmul.bf16.gmra.mxu3 %v1926_v33 }
 0x121   : > { %v1491_v38 = vmax.f32 %v1465_v36, 0.0 }
 0x122   : > { %v1263_v39 = vpop.f32.mrf.mxu2  ;;  %v1328_v40 = vpop.f32.mrf.mxu3 }
 0x123   : > { %v1949_v42 = vpack.c.bf16 %v1491_v38, %v1490_v37  ;;  %v1135_v43 = vpop.f32.mrf.mxu0  ;;  %v1200_v44 = vpop.f32.mrf.mxu1  ;;  %v1410_v46 = vmax.f32 %v1263_v39, %v1328_v40 }
 0x124   : > { %v1385_v52 = vmax.f32 %v1135_v43, %v1200_v44 }
 0x125   : > { %2002 = vst [vmem:[%s2331_s28 + $0x10] sm:$0xff] %v1949_v42   ;;  %v1436_v47 = vmax.f32 %v1384_v45, %v1410_v46 }
 0x127   : > { %v1466_v58 = vadd.f32 %v2320_v41, %v1436_v47 }
 0x129   : > { %v1492_v61 = vmax.f32 %v1466_v58, 0.0 }
 0x12a   : > { %v1265_v48 = vpop.f32.mrf.mxu2  ;;  %v1330_v49 = vpop.f32.mrf.mxu3 }
 0x12b   : > { %v1411_v53 = vmax.f32 %v1265_v48, %v1330_v49  ;;  %v1138_v54 = vpop.f32.mrf.mxu0  ;;  %v1203_v55 = vpop.f32.mrf.mxu1 }
 0x12c   : > { %v1386_v4 = vmax.f32 %v1138_v54, %v1203_v55 }
 0x12d   : > { %v1437_v59 = vmax.f32 %v1385_v52, %v1411_v53 }
 0x12e   : > { %1177 = vmatmul.bf16.gmra.mxu0 %v1888_v50  ;;  %1242 = vmatmul.bf16.gmra.mxu1 %v1901_v51 }
 0x12f   : > { %v1467_v60 = vadd.f32 %v2320_v41, %v1437_v59  ;;  %1307 = vmatmul.bf16.gmra.mxu2 %v1914_v56  ;;  %1372 = vmatmul.bf16.gmra.mxu3 %v1927_v57 }
 0x131   : > { %v1493_v62 = vmax.f32 %v1467_v60, 0.0 }
 0x132   : > { %v1268_v63 = vpop.f32.mrf.mxu2  ;;  %v1333_v0 = vpop.f32.mrf.mxu3 }
 0x133   : > { %v1954_v1 = vpack.c.bf16 %v1493_v62, %v1492_v61  ;;  %v1140_v2 = vpop.f32.mrf.mxu0  ;;  %v1205_v3 = vpop.f32.mrf.mxu1  ;;  %v1412_v5 = vmax.f32 %v1268_v63, %v1333_v0 }
 0x134   : > { %v1387_v9 = vmax.f32 %v1140_v2, %v1205_v3 }
 0x135   : > { %2003 = vst [vmem:[%s2331_s28 + $0x18] sm:$0xff] %v1954_v1   ;;  %v1438_v6 = vmax.f32 %v1386_v4, %v1412_v5 }
 0x137   : > { %v1468_v13 = vadd.f32 %v2320_v41, %v1438_v6 }
 0x139   : > { %v1494_v16 = vmax.f32 %v1468_v13, 0.0 }
 0x13a   : > { %v1270_v7 = vpop.f32.mrf.mxu2  ;;  %v1335_v8 = vpop.f32.mrf.mxu3 }
 0x13b   : > { %v1413_v10 = vmax.f32 %v1270_v7, %v1335_v8  ;;  %v1143_v11 = vpop.f32.mrf.mxu0  ;;  %v1208_v12 = vpop.f32.mrf.mxu1 }
 0x13c   : > { %v1388_v23 = vmax.f32 %v1143_v11, %v1208_v12 }
 0x13d   : > { %v1439_v14 = vmax.f32 %v1387_v9, %v1413_v10 }
 0x13f   : > { %v1469_v15 = vadd.f32 %v2320_v41, %v1439_v14 }
 0x141   : > { %v1495_v17 = vmax.f32 %v1469_v15, 0.0 }
 0x142   : > { %v1273_v18 = vpop.f32.mrf.mxu2  ;;  %v1338_v19 = vpop.f32.mrf.mxu3 }
 0x143   : > { %v1959_v20 = vpack.c.bf16 %v1495_v17, %v1494_v16  ;;  %v1145_v21 = vpop.f32.mrf.mxu0  ;;  %v1210_v22 = vpop.f32.mrf.mxu1  ;;  %v1414_v24 = vmax.f32 %v1273_v18, %v1338_v19 }
 0x144   : > { %v1389_v28 = vmax.f32 %v1145_v21, %v1210_v22 }
 0x145   : > { %2004 = vst [vmem:[%s2331_s28 + $0x20] sm:$0xff] %v1959_v20   ;;  %v1440_v25 = vmax.f32 %v1388_v23, %v1414_v24 }
 0x147   : > { %v1470_v32 = vadd.f32 %v2320_v41, %v1440_v25 }
 0x149   : > { %v1496_v35 = vmax.f32 %v1470_v32, 0.0 }
 0x14a   : > { %v1275_v26 = vpop.f32.mrf.mxu2  ;;  %v1340_v27 = vpop.f32.mrf.mxu3 }
 0x14b   : > { %v1415_v29 = vmax.f32 %v1275_v26, %v1340_v27  ;;  %v1148_v30 = vpop.f32.mrf.mxu0  ;;  %v1213_v31 = vpop.f32.mrf.mxu1 }
 0x14c   : > { %v1390_v43 = vmax.f32 %v1148_v30, %v1213_v31 }
 0x14d   : > { %v1441_v33 = vmax.f32 %v1389_v28, %v1415_v29 }
 0x14f   : > { %v1471_v34 = vadd.f32 %v2320_v41, %v1441_v33 }
 0x151   : > { %v1497_v36 = vmax.f32 %v1471_v34, 0.0 }
 0x152   : > { %v1278_v37 = vpop.f32.mrf.mxu2  ;;  %v1343_v38 = vpop.f32.mrf.mxu3 }
 0x153   : > { %v1964_v39 = vpack.c.bf16 %v1497_v36, %v1496_v35  ;;  %v1150_v40 = vpop.f32.mrf.mxu0  ;;  %v1215_v42 = vpop.f32.mrf.mxu1  ;;  %v1416_v44 = vmax.f32 %v1278_v37, %v1343_v38 }
 0x154   : > { %v1391_v48 = vmax.f32 %v1150_v40, %v1215_v42 }
 0x155   : > { %2005 = vst [vmem:[%s2331_s28 + $0x28] sm:$0xff] %v1964_v39   ;;  %v1442_v45 = vmax.f32 %v1390_v43, %v1416_v44 }
 0x157   : > { %v1472_v52 = vadd.f32 %v2320_v41, %v1442_v45 }
 0x159   : > { %v1498_v55 = vmax.f32 %v1472_v52, 0.0 }
 0x15a   : > { %v1280_v46 = vpop.f32.mrf.mxu2  ;;  %v1345_v47 = vpop.f32.mrf.mxu3 }
 0x15b   : > { %v1417_v49 = vmax.f32 %v1280_v46, %v1345_v47  ;;  %v1153_v50 = vpop.f32.mrf.mxu0  ;;  %v1218_v51 = vpop.f32.mrf.mxu1 }
 0x15c   : > { %v1392_v62 = vmax.f32 %v1153_v50, %v1218_v51 }
 0x15d   : > { %v1443_v53 = vmax.f32 %v1391_v48, %v1417_v49 }
 0x15f   : > { %v1473_v54 = vadd.f32 %v2320_v41, %v1443_v53 }
 0x161   : > { %v1499_v56 = vmax.f32 %v1473_v54, 0.0 }
 0x162   : > { %v1283_v57 = vpop.f32.mrf.mxu2  ;;  %v1348_v58 = vpop.f32.mrf.mxu3 }
 0x163   : > { %v1969_v59 = vpack.c.bf16 %v1499_v56, %v1498_v55  ;;  %v1155_v60 = vpop.f32.mrf.mxu0  ;;  %v1220_v61 = vpop.f32.mrf.mxu1  ;;  %v1418_v63 = vmax.f32 %v1283_v57, %v1348_v58 }
 0x164   : > { %v1393_v3 = vmax.f32 %v1155_v60, %v1220_v61 }
 0x165   : > { %2006 = vst [vmem:[%s2331_s28 + $0x30] sm:$0xff] %v1969_v59   ;;  %v1444_v0 = vmax.f32 %v1392_v62, %v1418_v63 }
 0x167   : > { %v1474_v7 = vadd.f32 %v2320_v41, %v1444_v0 }
 0x169   : > { %v1500_v10 = vmax.f32 %v1474_v7, 0.0 }
 0x16a   : > { %v1285_v1 = vpop.f32.mrf.mxu2  ;;  %v1350_v2 = vpop.f32.mrf.mxu3 }
 0x16b   : > { %v1419_v4 = vmax.f32 %v1285_v1, %v1350_v2  ;;  %v1158_v5 = vpop.f32.mrf.mxu0  ;;  %v1223_v6 = vpop.f32.mrf.mxu1 }
 0x16c   : > { %v1394_v17 = vmax.f32 %v1158_v5, %v1223_v6 }
 0x16d   : > { %v1445_v8 = vmax.f32 %v1393_v3, %v1419_v4 }
 0x16f   : > { %v1475_v9 = vadd.f32 %v2320_v41, %v1445_v8 }
 0x171   : > { %v1501_v11 = vmax.f32 %v1475_v9, 0.0 }
 0x172   : > { %v1288_v12 = vpop.f32.mrf.mxu2  ;;  %v1353_v13 = vpop.f32.mrf.mxu3 }
 0x173   : > { %v1974_v14 = vpack.c.bf16 %v1501_v11, %v1500_v10  ;;  %v1160_v15 = vpop.f32.mrf.mxu0  ;;  %v1225_v16 = vpop.f32.mrf.mxu1  ;;  %v1420_v18 = vmax.f32 %v1288_v12, %v1353_v13 }
 0x174   : > { %v1395_v22 = vmax.f32 %v1160_v15, %v1225_v16 }
 0x175   : > { %2007 = vst [vmem:[%s2331_s28 + $0x38] sm:$0xff] %v1974_v14   ;;  %v1446_v19 = vmax.f32 %v1394_v17, %v1420_v18 }
 0x177   : > { %v1476_v26 = vadd.f32 %v2320_v41, %v1446_v19 }
 0x179   : > { %v1502_v29 = vmax.f32 %v1476_v26, 0.0 }
 0x17a   : > { %v1290_v20 = vpop.f32.mrf.mxu2  ;;  %v1355_v21 = vpop.f32.mrf.mxu3 }
 0x17b   : > { %v1421_v23 = vmax.f32 %v1290_v20, %v1355_v21  ;;  %v1163_v24 = vpop.f32.mrf.mxu0  ;;  %v1228_v25 = vpop.f32.mrf.mxu1 }
 0x17c   : > { %v1396_v36 = vmax.f32 %v1163_v24, %v1228_v25 }
 0x17d   : > { %v1447_v27 = vmax.f32 %v1395_v22, %v1421_v23 }
 0x17f   : > { %v1477_v28 = vadd.f32 %v2320_v41, %v1447_v27 }
 0x181   : > { %v1503_v30 = vmax.f32 %v1477_v28, 0.0 }
 0x182   : > { %v1293_v31 = vpop.f32.mrf.mxu2  ;;  %v1358_v32 = vpop.f32.mrf.mxu3 }
 0x183   : > { %v1979_v33 = vpack.c.bf16 %v1503_v30, %v1502_v29  ;;  %v1165_v34 = vpop.f32.mrf.mxu0  ;;  %v1230_v35 = vpop.f32.mrf.mxu1  ;;  %v1422_v37 = vmax.f32 %v1293_v31, %v1358_v32 }
 0x184   : > { %v1397_v42 = vmax.f32 %v1165_v34, %v1230_v35 }
 0x185   : > { %2008 = vst [vmem:[%s2331_s28 + $0x40] sm:$0xff] %v1979_v33   ;;  %v1448_v38 = vmax.f32 %v1396_v36, %v1422_v37 }
 0x187   : > { %v1478_v46 = vadd.f32 %v2320_v41, %v1448_v38 }
 0x189   : > { %v1504_v49 = vmax.f32 %v1478_v46, 0.0 }
 0x18a   : > { %v1295_v39 = vpop.f32.mrf.mxu2  ;;  %v1360_v40 = vpop.f32.mrf.mxu3 }
 0x18b   : > { %v1423_v43 = vmax.f32 %v1295_v39, %v1360_v40  ;;  %v1168_v44 = vpop.f32.mrf.mxu0  ;;  %v1233_v45 = vpop.f32.mrf.mxu1 }
 0x18c   : > { %v1398_v56 = vmax.f32 %v1168_v44, %v1233_v45 }
 0x18d   : > { %v1449_v47 = vmax.f32 %v1397_v42, %v1423_v43 }
 0x18f   : > { %v1479_v48 = vadd.f32 %v2320_v41, %v1449_v47 }
 0x191   : > { %v1505_v50 = vmax.f32 %v1479_v48, 0.0 }
 0x192   : > { %v1298_v51 = vpop.f32.mrf.mxu2  ;;  %v1363_v52 = vpop.f32.mrf.mxu3 }
 0x193   : > { %v1984_v53 = vpack.c.bf16 %v1505_v50, %v1504_v49  ;;  %v1170_v54 = vpop.f32.mrf.mxu0  ;;  %v1235_v55 = vpop.f32.mrf.mxu1  ;;  %v1424_v57 = vmax.f32 %v1298_v51, %v1363_v52 }
 0x194   : > { %v1399_v61 = vmax.f32 %v1170_v54, %v1235_v55 }
 0x195   : > { %2009 = vst [vmem:[%s2331_s28 + $0x48] sm:$0xff] %v1984_v53   ;;  %v1450_v58 = vmax.f32 %v1398_v56, %v1424_v57 }
 0x197   : > { %v1480_v1 = vadd.f32 %v2320_v41, %v1450_v58 }
 0x199   : > { %v1506_v4 = vmax.f32 %v1480_v1, 0.0 }
 0x19a   : > { %v1300_v59 = vpop.f32.mrf.mxu2  ;;  %v1365_v60 = vpop.f32.mrf.mxu3 }
 0x19b   : > { %v1425_v62 = vmax.f32 %v1300_v59, %v1365_v60  ;;  %v1173_v63 = vpop.f32.mrf.mxu0  ;;  %v1238_v0 = vpop.f32.mrf.mxu1 }
 0x19c   : > { %v1400_v11 = vmax.f32 %v1173_v63, %v1238_v0 }
 0x19d   : > { %v1451_v2 = vmax.f32 %v1399_v61, %v1425_v62 }
 0x19f   : > { %v1481_v3 = vadd.f32 %v2320_v41, %v1451_v2 }
 0x1a1   : > { %v1507_v5 = vmax.f32 %v1481_v3, 0.0 }
 0x1a2   : > { %v1303_v6 = vpop.f32.mrf.mxu2  ;;  %v1368_v7 = vpop.f32.mrf.mxu3 }
 0x1a3   : > { %v1989_v8 = vpack.c.bf16 %v1507_v5, %v1506_v4  ;;  %v1175_v9 = vpop.f32.mrf.mxu0  ;;  %v1240_v10 = vpop.f32.mrf.mxu1  ;;  %v1426_v12 = vmax.f32 %v1303_v6, %v1368_v7 }
 0x1a4   : > { %v1401_v16 = vmax.f32 %v1175_v9, %v1240_v10 }
 0x1a5   : > { %2010 = vst [vmem:[%s2331_s28 + $0x50] sm:$0xff] %v1989_v8   ;;  %v1452_v13 = vmax.f32 %v1400_v11, %v1426_v12 }
 0x1a7   : > { %v1482_v18 = vadd.f32 %v2320_v41, %v1452_v13 }
 0x1a9   : > { %v1508_v23 = vmax.f32 %v1482_v18, 0.0 }
 0x1aa   : > { %v1305_v14 = vpop.f32.mrf.mxu2  ;;  %v1370_v15 = vpop.f32.mrf.mxu3 }
 0x1ab   : > { %v1427_v17 = vmax.f32 %v1305_v14, %v1370_v15  ;;  %v1178_v20 = vpop.f32.mrf.mxu0  ;;  %v1243_v21 = vpop.f32.mrf.mxu1 }
 0x1ac   : > { %v1402_v28 = vmax.f32 %v1178_v20, %v1243_v21 }
 0x1ad   : > { %v1453_v19 = vmax.f32 %v1401_v16, %v1427_v17 }
 0x1af   : > { %v1483_v22 = vadd.f32 %v2320_v41, %v1453_v19 }
 0x1b1   : > { %v1509_v24 = vmax.f32 %v1483_v22, 0.0 }
 0x1b2   : > { %v1308_v25 = vpop.f32.mrf.mxu2  ;;  %v1373_v26 = vpop.f32.mrf.mxu3 }
 0x1b3   : > { %v1994_v27 = vpack.c.bf16 %v1509_v24, %v1508_v23  ;;  %v1428_v29 = vmax.f32 %v1308_v25, %v1373_v26  ;;  %v1180_v30 = vpop.f32.mrf.mxu0  ;;  %v1245_v31 = vpop.f32.mrf.mxu1 }
 0x1b4   : > { %v1403_v35 = vmax.f32 %v1180_v30, %v1245_v31 }
 0x1b5   : > { %2011 = vst [vmem:[%s2331_s28 + $0x58] sm:$0xff] %v1994_v27   ;;  %v1454_v32 = vmax.f32 %v1402_v28, %v1428_v29 }
 0x1b7   : > { %v1484_v37 = vadd.f32 %v2320_v41, %v1454_v32 }
 0x1b9   : > { %v1510_v40 = vmax.f32 %v1484_v37, 0.0 }
 0x1ba   : > { %v1310_v33 = vpop.f32.mrf.mxu2  ;;  %v1375_v34 = vpop.f32.mrf.mxu3 }
 0x1bb   : > { %v1429_v36 = vmax.f32 %v1310_v33, %v1375_v34 }
 0x1bd   : > { %v1455_v38 = vmax.f32 %v1403_v35, %v1429_v36 }
 0x1bf   : > { %v1485_v39 = vadd.f32 %v2320_v41, %v1455_v38 }
 0x1c1   : > { %v1511_v42 = vmax.f32 %v1485_v39, 0.0 }
 0x1c3   : > { %v1999_v43 = vpack.c.bf16 %v1511_v42, %v1510_v40 }
 0x1c5   : > { %2012 = vst [vmem:[%s2331_s28 + $0x60] sm:$0xff] %v1999_v43  }
 0x1c6 PF: > { %p10_p9 = scmp.ge.s32.totalorder %s2125_s16, 4   ;;  %s2396_s12 = smov %s2082_s13 }
 0x1c7   : > { %s2397_s13 = smov %s2134_s19  ;;  %s2398_s14 = smov %s2125_s16 }
 0x1c8   :  { %12 = sbr.rel (!%p10_p9) target bundleno = 2 (0x2), region = 108 }

// kernel: net_forward.4
= control target key start
LH: loop header
LB: loop body
LE: loop exit
PB: predicated region body
PF: predicated region fallthrough
CT: control target
= control target key end

     0   :  { %s1177_s1 = inlined_call_operand.vmem [shape: bf16[256,128], index: 1, kind: input, shape index: {}]   ;;  %s1178_s0 = inlined_call_operand.vmem [shape: bf16[4,64,256], index: 0, kind: input, shape index: {}]   ;;  %s1179_s2 = inlined_call_operand.vmem [shape: f32[1,128], index: 2, kind: input, shape index: {}]   ;;  %s1180_s3 = inlined_call_operand.vmem [shape: bf16[64,128], index: 3, kind: output, shape index: {}]  }
   0x1   :  { %v807_v0 = vld [vmem:[%s1177_s1 + $0x38] sm:$0xff]  ;;  %v806_v2 = vld [vmem:[%s1177_s1 + $0x30] sm:$0xff]  ;;  %v805_v4 = vld [vmem:[%s1177_s1 + $0x28] sm:$0xff] }
   0x2   :  { %v815_v1 = vld [vmem:[%s1177_s1 + $0x78] sm:$0xff]  ;;  %334 = vmatpush.bf16.msra.mxu0 %v807_v0  ;;  %839 = vmatpush.bf16.msra.mxu2 %v807_v0  ;;  %v814_v3 = vld [vmem:[%s1177_s1 + $0x70] sm:$0xff]  ;;  %v813_v5 = vld [vmem:[%s1177_s1 + $0x68] sm:$0xff] }
   0x3   :  { %423 = vmatpush.bf16.msra.mxu1 %v815_v1  ;;  %847 = vmatpush.bf16.msra.mxu3 %v815_v1  ;;  %v804_v6 = vld [vmem:[%s1177_s1 + $0x20] sm:$0xff]  ;;  %v803_v8 = vld [vmem:[%s1177_s1 + $0x18] sm:$0xff]  ;;  %v802_v10 = vld [vmem:[%s1177_s1 + $0x10] sm:$0xff] }
   0x4   :  { %v812_v7 = vld [vmem:[%s1177_s1 + $0x60] sm:$0xff]  ;;  %v811_v9 = vld [vmem:[%s1177_s1 + $0x58] sm:$0xff]  ;;  %v810_v11 = vld [vmem:[%s1177_s1 + $0x50] sm:$0xff] }
   0x5   :  { %v801_v12 = vld [vmem:[%s1177_s1 + $0x8] sm:$0xff]  ;;  %v800_v14 = vld [vmem:[%s1177_s1] sm:$0xff]  ;;  %v586_v28 = vld [vmem:[%s1178_s0 + $0x10] sm:$0xf] }
   0x6   :  { %335 = vmatpush.bf16.msra.mxu0 %v806_v2  ;;  %840 = vmatpush.bf16.msra.mxu2 %v806_v2  ;;  %v809_v13 = vld [vmem:[%s1177_s1 + $0x48] sm:$0xff]  ;;  %v808_v15 = vld [vmem:[%s1177_s1 + $0x40] sm:$0xff]  ;;  %v771_v29 = vld [vmem:[%s1178_s0 + $0x14] sm:$0xf0] }
   0x7   :  { %424 = vmatpush.bf16.msra.mxu1 %v814_v3  ;;  %848 = vmatpush.bf16.msra.mxu3 %v814_v3  ;;  %v578_v16 = vld [vmem:[%s1178_s0] sm:$0xf]  ;;  %v769_v17 = vld [vmem:[%s1178_s0 + $0x4] sm:$0xf0]  ;;  %v768_v20 = vld [vmem:[%s1178_s0 + $0x4] sm:$0xf]  ;;  %v587_v36 = vor.u32 %v771_v29, %v586_v28 }
   0x8   :  { %v642_v18 = vld [vmem:[%s1178_s0 + $0x80] sm:$0xf]  ;;  %v785_v19 = vld [vmem:[%s1178_s0 + $0x84] sm:$0xf0]  ;;  %v580_v21 = vld [vmem:[%s1178_s0 + $0x8] sm:$0xf0]  ;;  %v579_v24 = vor.u32 %v769_v17, %v578_v16 }
   0x9   :  { %v784_v22 = vld [vmem:[%s1178_s0 + $0x84] sm:$0xf]  ;;  %v644_v23 = vld [vmem:[%s1178_s0 + $0x88] sm:$0xf0]  ;;  %v643_v25 = vor.u32 %v785_v19, %v642_v18  ;;  %v583_v26 = vor.u32 %v768_v20, %v580_v21  ;;  %v650_v30 = vld [vmem:[%s1178_s0 + $0x90] sm:$0xf] }
   0xa   :  { %336 = vmatpush.bf16.msra.mxu0 %v805_v4  ;;  %841 = vmatpush.bf16.msra.mxu2 %v805_v4  ;;  %v647_v27 = vor.u32 %v784_v22, %v644_v23  ;;  %v787_v31 = vld [vmem:[%s1178_s0 + $0x94] sm:$0xf0]  ;;  %v770_v32 = vld [vmem:[%s1178_s0 + $0x14] sm:$0xf]  ;;  %v588_v33 = vld [vmem:[%s1178_s0 + $0x18] sm:$0xf0] }
   0xb   :  { %425 = vmatpush.bf16.msra.mxu1 %v813_v5  ;;  %849 = vmatpush.bf16.msra.mxu3 %v813_v5  ;;  %v786_v34 = vld [vmem:[%s1178_s0 + $0x94] sm:$0xf]  ;;  %v652_v35 = vld [vmem:[%s1178_s0 + $0x98] sm:$0xf0]  ;;  %v651_v37 = vor.u32 %v787_v31, %v650_v30  ;;  %v591_v38 = vor.u32 %v770_v32, %v588_v33  ;;  %v594_v40 = vld [vmem:[%s1178_s0 + $0x20] sm:$0xf] }
   0xc   :  { %v655_v39 = vor.u32 %v786_v34, %v652_v35  ;;  %v773_v41 = vld [vmem:[%s1178_s0 + $0x24] sm:$0xf0]  ;;  %v658_v42 = vld [vmem:[%s1178_s0 + $0xa0] sm:$0xf]  ;;  %v772_v44 = vld [vmem:[%s1178_s0 + $0x24] sm:$0xf] }
   0xd   :  { %v789_v43 = vld [vmem:[%s1178_s0 + $0xa4] sm:$0xf0]  ;;  %v596_v45 = vld [vmem:[%s1178_s0 + $0x28] sm:$0xf0]  ;;  %v788_v46 = vld [vmem:[%s1178_s0 + $0xa4] sm:$0xf]  ;;  %v595_v48 = vor.u32 %v773_v41, %v594_v40 }
   0xe   :  { %337 = vmatpush.bf16.msra.mxu0 %v804_v6  ;;  %842 = vmatpush.bf16.msra.mxu2 %v804_v6  ;;  %v660_v47 = vld [vmem:[%s1178_s0 + $0xa8] sm:$0xf0]  ;;  %v659_v49 = vor.u32 %v789_v43, %v658_v42  ;;  %v599_v50 = vor.u32 %v772_v44, %v596_v45  ;;  %v602_v52 = vld [vmem:[%s1178_s0 + $0x30] sm:$0xf]  ;;  %v775_v53 = vld [vmem:[%s1178_s0 + $0x34] sm:$0xf0] }
   0xf   :  { %426 = vmatpush.bf16.msra.mxu1 %v812_v7  ;;  %850 = vmatpush.bf16.msra.mxu3 %v812_v7  ;;  %v663_v51 = vor.u32 %v788_v46, %v660_v47  ;;  %v666_v54 = vld [vmem:[%s1178_s0 + $0xb0] sm:$0xf]  ;;  %v791_v55 = vld [vmem:[%s1178_s0 + $0xb4] sm:$0xf0]  ;;  %v774_v56 = vld [vmem:[%s1178_s0 + $0x34] sm:$0xf]  ;;  %v603_v60 = vor.u32 %v775_v53, %v602_v52 }
  0x10   :  { %v604_v57 = vld [vmem:[%s1178_s0 + $0x38] sm:$0xf0]  ;;  %v790_v58 = vld [vmem:[%s1178_s0 + $0xb4] sm:$0xf]  ;;  %v667_v61 = vor.u32 %v791_v55, %v666_v54  ;;  %v610_v0 = vld [vmem:[%s1178_s0 + $0x40] sm:$0xf] }
  0x11   :  { %v668_v59 = vld [vmem:[%s1178_s0 + $0xb8] sm:$0xf0]  ;;  %v607_v62 = vor.u32 %v774_v56, %v604_v57  ;;  %v777_v1 = vld [vmem:[%s1178_s0 + $0x44] sm:$0xf0]  ;;  %v674_v2 = vld [vmem:[%s1178_s0 + $0xc0] sm:$0xf] }
  0x12   :  { %338 = vmatpush.bf16.msra.mxu0 %v803_v8  ;;  %843 = vmatpush.bf16.msra.mxu2 %v803_v8  ;;  %v671_v63 = vor.u32 %v790_v58, %v668_v59  ;;  %v793_v3 = vld [vmem:[%s1178_s0 + $0xc4] sm:$0xf0]  ;;  %v776_v4 = vld [vmem:[%s1178_s0 + $0x44] sm:$0xf]  ;;  %v612_v5 = vld [vmem:[%s1178_s0 + $0x48] sm:$0xf0]  ;;  %v611_v8 = vor.u32 %v777_v1, %v610_v0 }
  0x13   :  { %427 = vmatpush.bf16.msra.mxu1 %v811_v9  ;;  %851 = vmatpush.bf16.msra.mxu3 %v811_v9  ;;  %v792_v6 = vld [vmem:[%s1178_s0 + $0xc4] sm:$0xf]  ;;  %v676_v7 = vld [vmem:[%s1178_s0 + $0xc8] sm:$0xf0]  ;;  %v675_v9 = vor.u32 %v793_v3, %v674_v2  ;;  %v778_v16 = vld [vmem:[%s1178_s0 + $0x54] sm:$0xf] }
  0x14   :  { %v620_v17 = vld [vmem:[%s1178_s0 + $0x58] sm:$0xf0]  ;;  %v794_v18 = vld [vmem:[%s1178_s0 + $0xd4] sm:$0xf]  ;;  %v780_v28 = vld [vmem:[%s1178_s0 + $0x64] sm:$0xf] }
  0x15   :  { %v684_v19 = vld [vmem:[%s1178_s0 + $0xd8] sm:$0xf0]  ;;  %v623_v22 = vor.u32 %v778_v16, %v620_v17  ;;  %v628_v29 = vld [vmem:[%s1178_s0 + $0x68] sm:$0xf0]  ;;  %v796_v30 = vld [vmem:[%s1178_s0 + $0xe4] sm:$0xf] }
  0x16   :  { %339 = vmatpush.bf16.msra.mxu0 %v802_v10  ;;  %844 = vmatpush.bf16.msra.mxu2 %v802_v10  ;;  %v615_v10 = vor.u32 %v776_v4, %v612_v5  ;;  %v687_v23 = vor.u32 %v794_v18, %v684_v19  ;;  %v692_v31 = vld [vmem:[%s1178_s0 + $0xe8] sm:$0xf0]  ;;  %v631_v34 = vor.u32 %v780_v28, %v628_v29  ;;  %v782_v40 = vld [vmem:[%s1178_s0 + $0x74] sm:$0xf]  ;;  %v636_v41 = vld [vmem:[%s1178_s0 + $0x78] sm:$0xf0] }
  0x17   :  { %428 = vmatpush.bf16.msra.mxu1 %v810_v11  ;;  %852 = vmatpush.bf16.msra.mxu3 %v810_v11  ;;  %v679_v11 = vor.u32 %v792_v6, %v676_v7  ;;  %v695_v35 = vor.u32 %v796_v30, %v692_v31  ;;  %v798_v42 = vld [vmem:[%s1178_s0 + $0xf4] sm:$0xf]  ;;  %v700_v43 = vld [vmem:[%s1178_s0 + $0xf8] sm:$0xf0]  ;;  %v639_v46 = vor.u32 %v782_v40, %v636_v41 }
  0x18   :  { %v703_v47 = vor.u32 %v798_v42, %v700_v43 }
  0x1a   :  { %340 = vmatpush.bf16.msra.mxu0 %v801_v12  ;;  %845 = vmatpush.bf16.msra.mxu2 %v801_v12  ;;  %v618_v12 = vld [vmem:[%s1178_s0 + $0x50] sm:$0xf] }
  0x1b   :  { %429 = vmatpush.bf16.msra.mxu1 %v809_v13  ;;  %853 = vmatpush.bf16.msra.mxu3 %v809_v13  ;;  %v779_v13 = vld [vmem:[%s1178_s0 + $0x54] sm:$0xf0] }
  0x1c   :  { %v619_v20 = vor.u32 %v779_v13, %v618_v12 }
  0x1e   :  { %341 = vmatpush.bf16.msra.mxu0 %v800_v14  ;;  %846 = vmatpush.bf16.msra.mxu2 %v800_v14  ;;  %v682_v14 = vld [vmem:[%s1178_s0 + $0xd0] sm:$0xf] }
  0x1f   :  { %430 = vmatpush.bf16.msra.mxu1 %v808_v15  ;;  %854 = vmatpush.bf16.msra.mxu3 %v808_v15  ;;  %v795_v15 = vld [vmem:[%s1178_s0 + $0xd4] sm:$0xf0] }
  0x20   :  { %v683_v21 = vor.u32 %v795_v15, %v682_v14 }
  0x21   :  { %342 = vmatmul.bf16.vlgmr.msra.gmra.mxu0 %v579_v24  ;;  %382 = vmatmul.bf16.vlgmr.msra.gmra.mxu2 %v643_v25  ;;  %v626_v24 = vld [vmem:[%s1178_s0 + $0x60] sm:$0xf]  ;;  %v781_v25 = vld [vmem:[%s1178_s0 + $0x64] sm:$0xf0] }
  0x22   :  { %431 = vmatmul.bf16.vlgmr.msra.gmra.mxu1 %v583_v26  ;;  %471 = vmatmul.bf16.vlgmr.msra.gmra.mxu3 %v647_v27  ;;  %v690_v26 = vld [vmem:[%s1178_s0 + $0xe0] sm:$0xf]  ;;  %v797_v27 = vld [vmem:[%s1178_s0 + $0xe4] sm:$0xf0]  ;;  %v627_v32 = vor.u32 %v781_v25, %v626_v24 }
  0x23   :  { %v691_v33 = vor.u32 %v797_v27, %v690_v26 }
  0x31   :  { %347 = vmatmul.bf16.gmra.mxu0 %v587_v36  ;;  %387 = vmatmul.bf16.gmra.mxu2 %v651_v37  ;;  %v634_v36 = vld [vmem:[%s1178_s0 + $0x70] sm:$0xf]  ;;  %v783_v37 = vld [vmem:[%s1178_s0 + $0x74] sm:$0xf0] }
  0x32   :  { %436 = vmatmul.bf16.gmra.mxu1 %v591_v38  ;;  %476 = vmatmul.bf16.gmra.mxu3 %v655_v39  ;;  %v698_v38 = vld [vmem:[%s1178_s0 + $0xf0] sm:$0xf]  ;;  %v799_v39 = vld [vmem:[%s1178_s0 + $0xf4] sm:$0xf0]  ;;  %v635_v44 = vor.u32 %v783_v37, %v634_v36 }
  0x33   :  { %v699_v45 = vor.u32 %v799_v39, %v698_v38 }
  0x41   :  { %352 = vmatmul.bf16.gmra.mxu0 %v595_v48  ;;  %392 = vmatmul.bf16.gmra.mxu2 %v659_v49 }
  0x42   :  { %441 = vmatmul.bf16.gmra.mxu1 %v599_v50  ;;  %481 = vmatmul.bf16.gmra.mxu3 %v663_v51 }
  0x51   :  { %357 = vmatmul.bf16.gmra.mxu0 %v603_v60  ;;  %397 = vmatmul.bf16.gmra.mxu2 %v667_v61 }
  0x52   :  { %446 = vmatmul.bf16.gmra.mxu1 %v607_v62  ;;  %486 = vmatmul.bf16.gmra.mxu3 %v671_v63 }
  0x61   :  { %362 = vmatmul.bf16.gmra.mxu0 %v611_v8  ;;  %402 = vmatmul.bf16.gmra.mxu2 %v675_v9 }
  0x62   :  { %451 = vmatmul.bf16.gmra.mxu1 %v615_v10  ;;  %491 = vmatmul.bf16.gmra.mxu3 %v679_v11 }
  0x71   :  { %367 = vmatmul.bf16.gmra.mxu0 %v619_v20  ;;  %407 = vmatmul.bf16.gmra.mxu2 %v683_v21 }
  0x72   :  { %456 = vmatmul.bf16.gmra.mxu1 %v623_v22  ;;  %496 = vmatmul.bf16.gmra.mxu3 %v687_v23 }
  0x81   :  { %372 = vmatmul.bf16.gmra.mxu0 %v627_v32  ;;  %412 = vmatmul.bf16.gmra.mxu2 %v691_v33 }
  0x82   :  { %461 = vmatmul.bf16.gmra.mxu1 %v631_v34  ;;  %501 = vmatmul.bf16.gmra.mxu3 %v695_v35 }
  0x91   :  { %377 = vmatmul.bf16.gmra.mxu0 %v635_v44  ;;  %417 = vmatmul.bf16.gmra.mxu2 %v699_v45 }
  0x92   :  { %466 = vmatmul.bf16.gmra.mxu1 %v639_v46  ;;  %506 = vmatmul.bf16.gmra.mxu3 %v703_v47  ;;  %v1143_v46 = vld [vmem:[%s1179_s2] ss:$0 sm:$0xff] }
  0x9e   :  { %v343_v48 = vpop.f32.mrf.mxu0 }
  0x9f   :  { %v432_v49 = vpop.f32.mrf.mxu1 }
  0xa0   :  { %v433_v50 = vadd.f32 %v432_v49, %v343_v48 }
  0xa4   :  { %v383_v51 = vpop.f32.mrf.mxu2 }
  0xa5   :  { %v472_v52 = vpop.f32.mrf.mxu3 }
  0xa6   :  { %v473_v53 = vadd.f32 %v472_v52, %v383_v51  ;;  %v345_v54 = vpop.f32.mrf.mxu0 }
  0xa7   :  { %v434_v55 = vpop.f32.mrf.mxu1 }
  0xa8   :  { %v435_v56 = vadd.f32 %v434_v55, %v345_v54 }
  0xac   :  { %v385_v57 = vpop.f32.mrf.mxu2 }
  0xad   :  { %v474_v58 = vpop.f32.mrf.mxu3 }
  0xae   :  { %v475_v59 = vadd.f32 %v474_v58, %v385_v57  ;;  %v348_v60 = vpop.f32.mrf.mxu0 }
  0xaf   :  { %v437_v61 = vpop.f32.mrf.mxu1 }
  0xb0   :  { %v1116_v62 = vadd.f32 %v437_v61, %v348_v60 }
  0xb4   :  { %v388_v63 = vpop.f32.mrf.mxu2 }
  0xb5   :  { %v477_v0 = vpop.f32.mrf.mxu3 }
  0xb6   :  { %v1118_v1 = vadd.f32 %v477_v0, %v388_v63  ;;  %v350_v2 = vpop.f32.mrf.mxu0 }
  0xb7   :  { %v439_v3 = vpop.f32.mrf.mxu1 }
  0xb8   :  { %v1120_v4 = vadd.f32 %v439_v3, %v350_v2 }
  0xbc   :  { %v390_v5 = vpop.f32.mrf.mxu2 }
  0xbd   :  { %v479_v6 = vpop.f32.mrf.mxu3 }
  0xbe   :  { %v1122_v7 = vadd.f32 %v479_v6, %v390_v5  ;;  %v353_v8 = vpop.f32.mrf.mxu0 }
  0xbf   :  { %v442_v9 = vpop.f32.mrf.mxu1 }
  0xc0   :  { %v1124_v10 = vadd.f32 %v442_v9, %v353_v8 }
  0xc4   :  { %v393_v11 = vpop.f32.mrf.mxu2 }
  0xc5   :  { %v482_v12 = vpop.f32.mrf.mxu3 }
  0xc6   :  { %v1126_v13 = vadd.f32 %v482_v12, %v393_v11  ;;  %v355_v14 = vpop.f32.mrf.mxu0 }
  0xc7   :  { %v444_v15 = vpop.f32.mrf.mxu1 }
  0xc8   :  { %v1128_v16 = vadd.f32 %v444_v15, %v355_v14 }
  0xcc   :  { %v395_v17 = vpop.f32.mrf.mxu2 }
  0xcd   :  { %v484_v18 = vpop.f32.mrf.mxu3 }
  0xce   :  { %v1130_v19 = vadd.f32 %v484_v18, %v395_v17  ;;  %v358_v20 = vpop.f32.mrf.mxu0 }
  0xcf   :  { %v447_v21 = vpop.f32.mrf.mxu1 }
  0xd0   :  { %v1132_v22 = vadd.f32 %v447_v21, %v358_v20 }
  0xd4   :  { %v398_v23 = vpop.f32.mrf.mxu2 }
  0xd5   :  { %v487_v24 = vpop.f32.mrf.mxu3 }
  0xd6   :  { %v1134_v25 = vadd.f32 %v487_v24, %v398_v23  ;;  %v360_v26 = vpop.f32.mrf.mxu0 }
  0xd7   :  { %v449_v27 = vpop.f32.mrf.mxu1 }
  0xd8   :  { %v1136_v28 = vadd.f32 %v449_v27, %v360_v26 }
  0xdc   :  { %v400_v29 = vpop.f32.mrf.mxu2 }
  0xdd   :  { %v489_v30 = vpop.f32.mrf.mxu3 }
  0xde   :  { %v1138_v31 = vadd.f32 %v489_v30, %v400_v29  ;;  %v363_v32 = vpop.f32.mrf.mxu0 }
  0xdf   :  { %v452_v33 = vpop.f32.mrf.mxu1 }
  0xe0   :  { %v453_v34 = vadd.f32 %v452_v33, %v363_v32 }
  0xe2   :  { %v512_v40 = vmax.f32 %v433_v50, %v453_v34 }
  0xe4   :  { %v403_v35 = vpop.f32.mrf.mxu2 }
  0xe5   :  { %v492_v36 = vpop.f32.mrf.mxu3 }
  0xe6   :  { %v493_v37 = vadd.f32 %v492_v36, %v403_v35  ;;  %v365_v38 = vpop.f32.mrf.mxu0 }
  0xe7   :  { %v454_v39 = vpop.f32.mrf.mxu1 }
  0xe8   :  { %v520_v41 = vmax.f32 %v473_v53, %v493_v37  ;;  %v455_v43 = vadd.f32 %v454_v39, %v365_v38 }
  0xea   :  { %v528_v42 = vmax.f32 %v512_v40, %v520_v41  ;;  %v513_v51 = vmax.f32 %v435_v56, %v455_v43 }
  0xec   :  { %v405_v44 = vpop.f32.mrf.mxu2  ;;  %v540_v54 = vadd.f32 %v1143_v46, %v528_v42 }
  0xed   :  { %v494_v45 = vpop.f32.mrf.mxu3 }
  0xee   :  { %v495_v47 = vadd.f32 %v494_v45, %v405_v44  ;;  %v368_v48 = vpop.f32.mrf.mxu0  ;;  %v548_v60 = vmax.f32 %v540_v54, 0.0 }
  0xef   :  { %v457_v49 = vpop.f32.mrf.mxu1 }
  0xf0   :  { %v521_v52 = vmax.f32 %v475_v59, %v495_v47  ;;  %v458_v53 = vadd.f32 %v457_v49, %v368_v48 }
  0xf2   :  { %v529_v55 = vmax.f32 %v513_v51, %v521_v52  ;;  %v514_v5 = vmax.f32 %v1116_v62, %v458_v53 }
  0xf4   :  { %v541_v50 = vadd.f32 %v1143_v46, %v529_v55  ;;  %v408_v57 = vpop.f32.mrf.mxu2 }
  0xf5   :  { %v497_v58 = vpop.f32.mrf.mxu3 }
  0xf6   :  { %v549_v61 = vmax.f32 %v541_v50, 0.0  ;;  %v498_v63 = vadd.f32 %v497_v58, %v408_v57  ;;  %v370_v0 = vpop.f32.mrf.mxu0 }
  0xf7   :  { %v459_v2 = vpop.f32.mrf.mxu1 }
  0xf8   :  { %v819_v3 = vpack.c.bf16 %v549_v61, %v548_v60  ;;  %v522_v6 = vmax.f32 %v1118_v1, %v498_v63  ;;  %v460_v59 = vadd.f32 %v459_v2, %v370_v0 }
  0xfa   :  { %820 = vst [vmem:[%s1180_s3] sm:$0xff] %v819_v3   ;;  %v530_v56 = vmax.f32 %v514_v5, %v522_v6  ;;  %v515_v15 = vmax.f32 %v1120_v4, %v460_v59 }
  0xfc   :  { %v410_v8 = vpop.f32.mrf.mxu2  ;;  %v542_v18 = vadd.f32 %v1143_v46, %v530_v56 }
  0xfd   :  { %v499_v9 = vpop.f32.mrf.mxu3 }
  0xfe   :  { %v500_v11 = vadd.f32 %v499_v9, %v410_v8  ;;  %v373_v12 = vpop.f32.mrf.mxu0  ;;  %v550_v24 = vmax.f32 %v542_v18, 0.0 }
  0xff   :  { %v462_v14 = vpop.f32.mrf.mxu1 }
 0x100   :  { %v523_v17 = vmax.f32 %v1122_v7, %v500_v11  ;;  %v463_v20 = vadd.f32 %v462_v14, %v373_v12 }
 0x102   :  { %v531_v62 = vmax.f32 %v515_v15, %v523_v17  ;;  %v516_v33 = vmax.f32 %v1124_v10, %v463_v20 }
 0x104   :  { %v543_v1 = vadd.f32 %v1143_v46, %v531_v62  ;;  %v413_v21 = vpop.f32.mrf.mxu2 }
 0x105   :  { %v502_v23 = vpop.f32.mrf.mxu3 }
 0x106   :  { %v551_v26 = vmax.f32 %v543_v1, 0.0  ;;  %v503_v27 = vadd.f32 %v502_v23, %v413_v21  ;;  %v375_v29 = vpop.f32.mrf.mxu0 }
 0x107   :  { %v464_v30 = vpop.f32.mrf.mxu1 }
 0x108   :  { %v824_v32 = vpack.c.bf16 %v551_v26, %v550_v24  ;;  %v524_v4 = vmax.f32 %v1126_v13, %v503_v27  ;;  %v465_v34 = vadd.f32 %v464_v30, %v375_v29 }
 0x10a   :  { %836 = vst [vmem:[%s1180_s3 + $0x8] sm:$0xff] %v824_v32   ;;  %v532_v7 = vmax.f32 %v516_v33, %v524_v4  ;;  %v517_v40 = vmax.f32 %v1128_v16, %v465_v34 }
 0x10c   :  { %v415_v35 = vpop.f32.mrf.mxu2  ;;  %v544_v42 = vadd.f32 %v1143_v46, %v532_v7 }
 0x10d   :  { %v504_v36 = vpop.f32.mrf.mxu3 }
 0x10e   :  { %v505_v37 = vadd.f32 %v504_v36, %v415_v35  ;;  %v378_v38 = vpop.f32.mrf.mxu0  ;;  %v552_v47 = vmax.f32 %v544_v42, 0.0 }
 0x10f   :  { %v467_v39 = vpop.f32.mrf.mxu1 }
 0x110   :  { %v525_v41 = vmax.f32 %v1130_v19, %v505_v37  ;;  %v468_v43 = vadd.f32 %v467_v39, %v378_v38 }
 0x112   :  { %v533_v10 = vmax.f32 %v517_v40, %v525_v41  ;;  %v518_v52 = vmax.f32 %v1132_v22, %v468_v43 }
 0x114   :  { %v545_v13 = vadd.f32 %v1143_v46, %v533_v10  ;;  %v418_v44 = vpop.f32.mrf.mxu2 }
 0x115   :  { %v507_v45 = vpop.f32.mrf.mxu3 }
 0x116   :  { %v553_v48 = vmax.f32 %v545_v13, 0.0  ;;  %v508_v49 = vadd.f32 %v507_v45, %v418_v44  ;;  %v380_v55 = vpop.f32.mrf.mxu0 }
 0x117   :  { %v469_v16 = vpop.f32.mrf.mxu1 }
 0x118   :  { %v829_v51 = vpack.c.bf16 %v553_v48, %v552_v47  ;;  %v526_v54 = vmax.f32 %v1134_v25, %v508_v49  ;;  %v470_v50 = vadd.f32 %v469_v16, %v380_v55 }
 0x11a   :  { %837 = vst [vmem:[%s1180_s3 + $0x10] sm:$0xff] %v829_v51   ;;  %v534_v19 = vmax.f32 %v518_v52, %v526_v54  ;;  %v519_v60 = vmax.f32 %v1136_v28, %v470_v50 }
 0x11c   :  { %v420_v53 = vpop.f32.mrf.mxu2  ;;  %v546_v63 = vadd.f32 %v1143_v46, %v534_v19 }
 0x11d   :  { %v509_v57 = vpop.f32.mrf.mxu3 }
 0x11e   :  { %v510_v58 = vadd.f32 %v509_v57, %v420_v53  ;;  %v554_v0 = vmax.f32 %v546_v63, 0.0 }
 0x120   :  { %v527_v61 = vmax.f32 %v1138_v31, %v510_v58 }
 0x122   :  { %v535_v22 = vmax.f32 %v519_v60, %v527_v61 }
 0x124   :  { %v547_v25 = vadd.f32 %v1143_v46, %v535_v22 }
 0x126   :  { %v555_v2 = vmax.f32 %v547_v25, 0.0 }
 0x128   :  { %v834_v3 = vpack.c.bf16 %v555_v2, %v554_v0 }
 0x12a   :  { %838 = vst [vmem:[%s1180_s3 + $0x18] sm:$0xff] %v834_v3  }

// kernel: net_forward.5
= control target key start
LH: loop header
LB: loop body
LE: loop exit
PB: predicated region body
PF: predicated region fallthrough
CT: control target
= control target key end

     0   :  { %s4369_s1 = inlined_call_operand.vmem [shape: bf16[3200,128], index: 1, kind: input, shape index: {}]   ;;  %s4370_s0 = inlined_call_operand.vmem [shape: bf16[16,3200], index: 0, kind: input, shape index: {}]   ;;  %s4371_s2 = inlined_call_operand.vmem [shape: f32[1,128], index: 2, kind: input, shape index: {}]   ;;  %s4372_s4 = inlined_call_operand.vmem [shape: f32[1,128], index: 4, kind: input, shape index: {}]   ;;  %s4373_s3 = inlined_call_operand.vmem [shape: bf16[128,128], index: 3, kind: input, shape index: {}]   ;;  %s4374_s5 = inlined_call_operand.vmem [shape: bf16[128,128], index: 5, kind: input, shape index: {}]   ;;  %s4375_s6 = inlined_call_operand.vmem [shape: f32[1,128], index: 6, kind: input, shape index: {}]   ;;  %s4376_s7 = inlined_call_operand.vmem [shape: f32[16,128], index: 7, kind: output, shape index: {}]  }
   0x1   :  { %v3304_v0 = vld [vmem:[%s4369_s1 + $0x38] sm:$0xff]  ;;  %v3303_v4 = vld [vmem:[%s4369_s1 + $0x30] sm:$0xff]  ;;  %v3302_v8 = vld [vmem:[%s4369_s1 + $0x28] sm:$0xff] }
   0x2   :  { %v3320_v1 = vld [vmem:[%s4369_s1 + $0xb8] sm:$0xff]  ;;  %1782 = vmatpush.bf16.msra.mxu0 %v3304_v0  ;;  %v3319_v5 = vld [vmem:[%s4369_s1 + $0xb0] sm:$0xff]  ;;  %v3318_v9 = vld [vmem:[%s4369_s1 + $0xa8] sm:$0xff] }
   0x3   :  { %v3312_v2 = vld [vmem:[%s4369_s1 + $0x78] sm:$0xff]  ;;  %1810 = vmatpush.bf16.msra.mxu2 %v3320_v1  ;;  %v3311_v6 = vld [vmem:[%s4369_s1 + $0x70] sm:$0xff]  ;;  %v3310_v10 = vld [vmem:[%s4369_s1 + $0x68] sm:$0xff] }
   0x4   :  { %v3328_v3 = vld [vmem:[%s4369_s1 + $0xf8] sm:$0xff]  ;;  %1796 = vmatpush.bf16.msra.mxu1 %v3312_v2  ;;  %v3327_v7 = vld [vmem:[%s4369_s1 + $0xf0] sm:$0xff]  ;;  %v3326_v11 = vld [vmem:[%s4369_s1 + $0xe8] sm:$0xff] }
   0x5   :  { %1824 = vmatpush.bf16.msra.mxu3 %v3328_v3  ;;  %v3301_v12 = vld [vmem:[%s4369_s1 + $0x20] sm:$0xff]  ;;  %v3300_v16 = vld [vmem:[%s4369_s1 + $0x18] sm:$0xff]  ;;  %v3299_v20 = vld [vmem:[%s4369_s1 + $0x10] sm:$0xff] }
   0x6   :  { %1783 = vmatpush.bf16.msra.mxu0 %v3303_v4  ;;  %v3317_v13 = vld [vmem:[%s4369_s1 + $0xa0] sm:$0xff]  ;;  %v3316_v17 = vld [vmem:[%s4369_s1 + $0x98] sm:$0xff]  ;;  %v3315_v21 = vld [vmem:[%s4369_s1 + $0x90] sm:$0xff] }
   0x7   :  { %1811 = vmatpush.bf16.msra.mxu2 %v3319_v5  ;;  %v3309_v14 = vld [vmem:[%s4369_s1 + $0x60] sm:$0xff]  ;;  %v3308_v18 = vld [vmem:[%s4369_s1 + $0x58] sm:$0xff]  ;;  %v3307_v22 = vld [vmem:[%s4369_s1 + $0x50] sm:$0xff] }
   0x8   :  { %1797 = vmatpush.bf16.msra.mxu1 %v3311_v6  ;;  %v3325_v15 = vld [vmem:[%s4369_s1 + $0xe0] sm:$0xff]  ;;  %v3324_v19 = vld [vmem:[%s4369_s1 + $0xd8] sm:$0xff]  ;;  %v3323_v23 = vld [vmem:[%s4369_s1 + $0xd0] sm:$0xff] }
   0x9   :  { %1825 = vmatpush.bf16.msra.mxu3 %v3327_v7  ;;  %v3298_v24 = vld [vmem:[%s4369_s1 + $0x8] sm:$0xff]  ;;  %v3297_v28 = vld [vmem:[%s4369_s1] sm:$0xff]  ;;  %v3336_v30 = vld [vmem:[%s4369_s1 + $0x138] sm:$0xff] }
   0xa   :  { %1784 = vmatpush.bf16.msra.mxu0 %v3302_v8  ;;  %v3314_v25 = vld [vmem:[%s4369_s1 + $0x88] sm:$0xff]  ;;  %v3313_v29 = vld [vmem:[%s4369_s1 + $0x80] sm:$0xff]  ;;  %v3352_v31 = vld [vmem:[%s4369_s1 + $0x1b8] sm:$0xff] }
   0xb   :  { %1812 = vmatpush.bf16.msra.mxu2 %v3318_v9  ;;  %v3306_v26 = vld [vmem:[%s4369_s1 + $0x48] sm:$0xff]  ;;  %v3305_v32 = vld [vmem:[%s4369_s1 + $0x40] sm:$0xff]  ;;  %v3344_v38 = vld [vmem:[%s4369_s1 + $0x178] sm:$0xff] }
   0xc   :  { %1798 = vmatpush.bf16.msra.mxu1 %v3310_v10  ;;  %v3322_v27 = vld [vmem:[%s4369_s1 + $0xc8] sm:$0xff]  ;;  %v3321_v33 = vld [vmem:[%s4369_s1 + $0xc0] sm:$0xff]  ;;  %v3360_v39 = vld [vmem:[%s4369_s1 + $0x1f8] sm:$0xff] }
   0xd   :  { %1826 = vmatpush.bf16.msra.mxu3 %v3326_v11  ;;  %v2310_v34 = vld [vmem:[%s4370_s0] sm:$0xf]  ;;  %v3284_v35 = vld [vmem:[%s4370_s0 + $0x60] sm:$0xf0]  ;;  %v2318_v36 = vld [vmem:[%s4370_s0 + $0x8] sm:$0xf] }
   0xe   :  { %1785 = vmatpush.bf16.msra.mxu0 %v3301_v12  ;;  %v3285_v37 = vld [vmem:[%s4370_s0 + $0x68] sm:$0xf0]  ;;  %v3272_v40 = vld [vmem:[%s4370_s0 + $0x4] sm:$0xf]  ;;  %v2312_v41 = vld [vmem:[%s4370_s0 + $0x64] sm:$0xf0]  ;;  %v2311_v44 = vor.u32 %v3284_v35, %v2310_v34 }
   0xf   :  { %1813 = vmatpush.bf16.msra.mxu2 %v3317_v13  ;;  %v3273_v42 = vld [vmem:[%s4370_s0 + $0xc] sm:$0xf]  ;;  %v2320_v43 = vld [vmem:[%s4370_s0 + $0x6c] sm:$0xf0]  ;;  %v2319_v45 = vor.u32 %v3285_v37, %v2318_v36  ;;  %v2315_v48 = vor.u32 %v3272_v40, %v2312_v41  ;;  %v3333_v56 = vld [vmem:[%s4369_s1 + $0x120] sm:$0xff] }
  0x10   :  { %1799 = vmatpush.bf16.msra.mxu1 %v3309_v14  ;;  %v3335_v46 = vld [vmem:[%s4369_s1 + $0x130] sm:$0xff]  ;;  %v2323_v49 = vor.u32 %v3273_v42, %v2320_v43  ;;  %v3334_v52 = vld [vmem:[%s4369_s1 + $0x128] sm:$0xff]  ;;  %v3349_v57 = vld [vmem:[%s4369_s1 + $0x1a0] sm:$0xff] }
  0x11   :  { %1827 = vmatpush.bf16.msra.mxu3 %v3325_v15  ;;  %v3351_v47 = vld [vmem:[%s4369_s1 + $0x1b0] sm:$0xff]  ;;  %v3350_v53 = vld [vmem:[%s4369_s1 + $0x1a8] sm:$0xff]  ;;  %v3341_v58 = vld [vmem:[%s4369_s1 + $0x160] sm:$0xff] }
  0x12   :  { %1786 = vmatpush.bf16.msra.mxu0 %v3300_v16  ;;  %v3343_v50 = vld [vmem:[%s4369_s1 + $0x170] sm:$0xff]  ;;  %v3342_v54 = vld [vmem:[%s4369_s1 + $0x168] sm:$0xff]  ;;  %v3357_v59 = vld [vmem:[%s4369_s1 + $0x1e0] sm:$0xff] }
  0x13   :  { %1814 = vmatpush.bf16.msra.mxu2 %v3316_v17  ;;  %v3359_v51 = vld [vmem:[%s4369_s1 + $0x1f0] sm:$0xff]  ;;  %v3358_v55 = vld [vmem:[%s4369_s1 + $0x1e8] sm:$0xff]  ;;  %v3332_v60 = vld [vmem:[%s4369_s1 + $0x118] sm:$0xff] }
  0x14   :  { %1800 = vmatpush.bf16.msra.mxu1 %v3308_v18  ;;  %v3348_v61 = vld [vmem:[%s4369_s1 + $0x198] sm:$0xff]  ;;  %v3331_v0 = vld [vmem:[%s4369_s1 + $0x110] sm:$0xff]  ;;  %v3330_v4 = vld [vmem:[%s4369_s1 + $0x108] sm:$0xff] }
  0x15   :  { %1828 = vmatpush.bf16.msra.mxu3 %v3324_v19  ;;  %v3340_v62 = vld [vmem:[%s4369_s1 + $0x158] sm:$0xff]  ;;  %v3347_v1 = vld [vmem:[%s4369_s1 + $0x190] sm:$0xff]  ;;  %v3346_v5 = vld [vmem:[%s4369_s1 + $0x188] sm:$0xff] }
  0x16   :  { %1787 = vmatpush.bf16.msra.mxu0 %v3299_v20  ;;  %v3356_v63 = vld [vmem:[%s4369_s1 + $0x1d8] sm:$0xff]  ;;  %v3339_v2 = vld [vmem:[%s4369_s1 + $0x150] sm:$0xff]  ;;  %v3338_v6 = vld [vmem:[%s4369_s1 + $0x148] sm:$0xff] }
  0x17   :  { %1815 = vmatpush.bf16.msra.mxu2 %v3315_v21  ;;  %v3355_v3 = vld [vmem:[%s4369_s1 + $0x1d0] sm:$0xff]  ;;  %v3354_v7 = vld [vmem:[%s4369_s1 + $0x1c8] sm:$0xff]  ;;  %v3329_v8 = vld [vmem:[%s4369_s1 + $0x100] sm:$0xff] }
  0x18   :  { %1801 = vmatpush.bf16.msra.mxu1 %v3307_v22  ;;  %v3345_v9 = vld [vmem:[%s4369_s1 + $0x180] sm:$0xff]  ;;  %v3368_v10 = vld [vmem:[%s4369_s1 + $0x238] sm:$0xff]  ;;  %v2326_v12 = vld [vmem:[%s4370_s0 + $0x10] sm:$0xf] }
  0x19   :  { %1829 = vmatpush.bf16.msra.mxu3 %v3323_v23  ;;  %v3384_v11 = vld [vmem:[%s4369_s1 + $0x2b8] sm:$0xff]  ;;  %v3286_v13 = vld [vmem:[%s4370_s0 + $0x70] sm:$0xf0]  ;;  %v3337_v16 = vld [vmem:[%s4369_s1 + $0x140] sm:$0xff] }
  0x1a   :  { %1788 = vmatpush.bf16.msra.mxu0 %v3298_v24  ;;  %v2334_v14 = vld [vmem:[%s4370_s0 + $0x18] sm:$0xf]  ;;  %v3287_v15 = vld [vmem:[%s4370_s0 + $0x78] sm:$0xf0]  ;;  %v3353_v17 = vld [vmem:[%s4369_s1 + $0x1c0] sm:$0xff]  ;;  %v2327_v22 = vor.u32 %v3286_v13, %v2326_v12 }
  0x1b   :  { %1816 = vmatpush.bf16.msra.mxu2 %v3314_v25  ;;  %v3274_v18 = vld [vmem:[%s4370_s0 + $0x14] sm:$0xf]  ;;  %v2328_v19 = vld [vmem:[%s4370_s0 + $0x74] sm:$0xf0]  ;;  %v3275_v20 = vld [vmem:[%s4370_s0 + $0x1c] sm:$0xf]  ;;  %v2335_v23 = vor.u32 %v3287_v15, %v2334_v14 }
  0x1c   :  { %1802 = vmatpush.bf16.msra.mxu1 %v3306_v26  ;;  %v2336_v21 = vld [vmem:[%s4370_s0 + $0x7c] sm:$0xf0]  ;;  %v3376_v24 = vld [vmem:[%s4369_s1 + $0x278] sm:$0xff]  ;;  %v2331_v26 = vor.u32 %v3274_v18, %v2328_v19  ;;  %v3374_v34 = vld [vmem:[%s4369_s1 + $0x268] sm:$0xff] }
  0x1d   :  { %1830 = vmatpush.bf16.msra.mxu3 %v3322_v27  ;;  %v3392_v25 = vld [vmem:[%s4369_s1 + $0x2f8] sm:$0xff]  ;;  %v2339_v27 = vor.u32 %v3275_v20, %v2336_v21  ;;  %v3390_v35 = vld [vmem:[%s4369_s1 + $0x2e8] sm:$0xff]  ;;  %v3365_v36 = vld [vmem:[%s4369_s1 + $0x220] sm:$0xff] }
  0x1e   :  { %1789 = vmatpush.bf16.msra.mxu0 %v3297_v28  ;;  %v3367_v28 = vld [vmem:[%s4369_s1 + $0x230] sm:$0xff]  ;;  %v3381_v37 = vld [vmem:[%s4369_s1 + $0x2a0] sm:$0xff]  ;;  %v3364_v40 = vld [vmem:[%s4369_s1 + $0x218] sm:$0xff] }
  0x1f   :  { %1817 = vmatpush.bf16.msra.mxu2 %v3313_v29  ;;  %v3383_v29 = vld [vmem:[%s4369_s1 + $0x2b0] sm:$0xff]  ;;  %v3380_v41 = vld [vmem:[%s4369_s1 + $0x298] sm:$0xff]  ;;  %v3398_v12 = vld [vmem:[%s4369_s1 + $0x328] sm:$0xff] }
  0x20   :  { %1803 = vmatpush.bf16.msra.mxu1 %v3305_v32  ;;  %v3366_v32 = vld [vmem:[%s4369_s1 + $0x228] sm:$0xff]  ;;  %v3372_v42 = vld [vmem:[%s4369_s1 + $0x258] sm:$0xff]  ;;  %v3405_v18 = vld [vmem:[%s4369_s1 + $0x360] sm:$0xff] }
  0x21   :  { %1831 = vmatpush.bf16.msra.mxu3 %v3321_v33  ;;  %1790 = vmatmul.bf16.vlgmr.msra.gmra.mxu0 %v2311_v44  ;;  %v3382_v33 = vld [vmem:[%s4369_s1 + $0x2a8] sm:$0xff]  ;;  %v3388_v43 = vld [vmem:[%s4369_s1 + $0x2d8] sm:$0xff]  ;;  %v3363_v44 = vld [vmem:[%s4369_s1 + $0x210] sm:$0xff] }
  0x22   :  { %1838 = vmatpush.bf16.msrb.mxu0 %v3336_v30  ;;  %1818 = vmatmul.bf16.vlgmr.msra.gmra.mxu2 %v2319_v45  ;;  %v3375_v30 = vld [vmem:[%s4369_s1 + $0x270] sm:$0xff]  ;;  %v3414_v13 = vld [vmem:[%s4369_s1 + $0x3a8] sm:$0xff]  ;;  %v3421_v19 = vld [vmem:[%s4369_s1 + $0x3e0] sm:$0xff] }
  0x23   :  { %1866 = vmatpush.bf16.msrb.mxu2 %v3352_v31  ;;  %1804 = vmatmul.bf16.vlgmr.msra.gmra.mxu1 %v2315_v48  ;;  %v3391_v31 = vld [vmem:[%s4369_s1 + $0x2f0] sm:$0xff]  ;;  %v3362_v48 = vld [vmem:[%s4369_s1 + $0x208] sm:$0xff]  ;;  %v3396_v20 = vld [vmem:[%s4369_s1 + $0x318] sm:$0xff] }
  0x24   :  { %1852 = vmatpush.bf16.msrb.mxu1 %v3344_v38  ;;  %1832 = vmatmul.bf16.vlgmr.msra.gmra.mxu3 %v2323_v49  ;;  %v3373_v38 = vld [vmem:[%s4369_s1 + $0x260] sm:$0xff]  ;;  %v3379_v45 = vld [vmem:[%s4369_s1 + $0x290] sm:$0xff]  ;;  %v3378_v49 = vld [vmem:[%s4369_s1 + $0x288] sm:$0xff] }
  0x25   :  { %1880 = vmatpush.bf16.msrb.mxu3 %v3360_v39  ;;  %v3389_v39 = vld [vmem:[%s4369_s1 + $0x2e0] sm:$0xff]  ;;  %v3406_v14 = vld [vmem:[%s4369_s1 + $0x368] sm:$0xff]  ;;  %v3412_v21 = vld [vmem:[%s4369_s1 + $0x398] sm:$0xff] }
  0x26   :  { %1839 = vmatpush.bf16.msrb.mxu0 %v3335_v46  ;;  %v3371_v46 = vld [vmem:[%s4369_s1 + $0x250] sm:$0xff]  ;;  %v3422_v15 = vld [vmem:[%s4369_s1 + $0x3e8] sm:$0xff] }
  0x27   :  { %1867 = vmatpush.bf16.msrb.mxu2 %v3351_v47  ;;  %v3387_v47 = vld [vmem:[%s4369_s1 + $0x2d0] sm:$0xff] }
  0x28   :  { %1853 = vmatpush.bf16.msrb.mxu1 %v3343_v50  ;;  %v3370_v50 = vld [vmem:[%s4369_s1 + $0x248] sm:$0xff] }
  0x29   :  { %1881 = vmatpush.bf16.msrb.mxu3 %v3359_v51  ;;  %v3386_v51 = vld [vmem:[%s4369_s1 + $0x2c8] sm:$0xff] }
  0x2a   :  { %1840 = vmatpush.bf16.msrb.mxu0 %v3334_v52  ;;  %v3361_v52 = vld [vmem:[%s4369_s1 + $0x200] sm:$0xff] }
  0x2b   :  { %1868 = vmatpush.bf16.msrb.mxu2 %v3350_v53  ;;  %v3377_v53 = vld [vmem:[%s4369_s1 + $0x280] sm:$0xff] }
  0x2c   :  { %1854 = vmatpush.bf16.msrb.mxu1 %v3342_v54  ;;  %v3400_v54 = vld [vmem:[%s4369_s1 + $0x338] sm:$0xff] }
  0x2d   :  { %1882 = vmatpush.bf16.msrb.mxu3 %v3358_v55  ;;  %v3416_v55 = vld [vmem:[%s4369_s1 + $0x3b8] sm:$0xff] }
  0x2e   :  { %1841 = vmatpush.bf16.msrb.mxu0 %v3333_v56  ;;  %v2342_v56 = vld [vmem:[%s4370_s0 + $0x20] sm:$0xf] }
  0x2f   :  { %1869 = vmatpush.bf16.msrb.mxu2 %v3349_v57  ;;  %v3288_v57 = vld [vmem:[%s4370_s0 + $0x80] sm:$0xf0] }
  0x30   :  { %1855 = vmatpush.bf16.msrb.mxu1 %v3341_v58  ;;  %v2350_v58 = vld [vmem:[%s4370_s0 + $0x28] sm:$0xf] }
  0x31   :  { %1883 = vmatpush.bf16.msrb.mxu3 %v3357_v59  ;;  %v3289_v59 = vld [vmem:[%s4370_s0 + $0x88] sm:$0xf0] }
  0x32   :  { %1842 = vmatpush.bf16.msrb.mxu0 %v3332_v60  ;;  %v3369_v60 = vld [vmem:[%s4369_s1 + $0x240] sm:$0xff] }
  0x33   :  { %1870 = vmatpush.bf16.msrb.mxu2 %v3348_v61  ;;  %v3385_v61 = vld [vmem:[%s4369_s1 + $0x2c0] sm:$0xff] }
  0x34   :  { %1856 = vmatpush.bf16.msrb.mxu1 %v3340_v62  ;;  %v3276_v62 = vld [vmem:[%s4370_s0 + $0x24] sm:$0xf] }
  0x35   :  { %1884 = vmatpush.bf16.msrb.mxu3 %v3356_v63  ;;  %v2344_v63 = vld [vmem:[%s4370_s0 + $0x84] sm:$0xf0] }
  0x36   :  { %1843 = vmatpush.bf16.msrb.mxu0 %v3331_v0  ;;  %v3277_v0 = vld [vmem:[%s4370_s0 + $0x2c] sm:$0xf] }
  0x37   :  { %1871 = vmatpush.bf16.msrb.mxu2 %v3347_v1  ;;  %v2352_v1 = vld [vmem:[%s4370_s0 + $0x8c] sm:$0xf0] }
  0x38   :  { %1857 = vmatpush.bf16.msrb.mxu1 %v3339_v2  ;;  %v2343_v2 = vor.u32 %v3288_v57, %v2342_v56  ;;  %v3430_v56 = vld [vmem:[%s4369_s1 + $0x428] sm:$0xff] }
  0x39   :  { %1885 = vmatpush.bf16.msrb.mxu3 %v3355_v3  ;;  %v2351_v3 = vor.u32 %v3289_v59, %v2350_v58  ;;  %v3446_v57 = vld [vmem:[%s4369_s1 + $0x4a8] sm:$0xff] }
  0x3a   :  { %1844 = vmatpush.bf16.msrb.mxu0 %v3330_v4  ;;  %v3408_v4 = vld [vmem:[%s4369_s1 + $0x378] sm:$0xff]  ;;  %v3438_v58 = vld [vmem:[%s4369_s1 + $0x468] sm:$0xff] }
  0x3b   :  { %1872 = vmatpush.bf16.msrb.mxu2 %v3346_v5  ;;  %v3424_v5 = vld [vmem:[%s4369_s1 + $0x3f8] sm:$0xff]  ;;  %v3454_v59 = vld [vmem:[%s4369_s1 + $0x4e8] sm:$0xff] }
  0x3c   :  { %1858 = vmatpush.bf16.msrb.mxu1 %v3338_v6  ;;  %v2347_v6 = vor.u32 %v3276_v62, %v2344_v63  ;;  %v3437_v62 = vld [vmem:[%s4369_s1 + $0x460] sm:$0xff] }
  0x3d   :  { %1886 = vmatpush.bf16.msrb.mxu3 %v3354_v7  ;;  %v2355_v7 = vor.u32 %v3277_v0, %v2352_v1  ;;  %v3453_v63 = vld [vmem:[%s4369_s1 + $0x4e0] sm:$0xff]  ;;  %v3428_v0 = vld [vmem:[%s4369_s1 + $0x418] sm:$0xff] }
  0x3e   :  { %1845 = vmatpush.bf16.msrb.mxu0 %v3329_v8  ;;  %v3399_v8 = vld [vmem:[%s4369_s1 + $0x330] sm:$0xff]  ;;  %v3444_v1 = vld [vmem:[%s4369_s1 + $0x498] sm:$0xff] }
  0x3f   :  { %1873 = vmatpush.bf16.msrb.mxu2 %v3345_v9  ;;  %v3415_v9 = vld [vmem:[%s4369_s1 + $0x3b0] sm:$0xff] }
  0x40   :  { %1859 = vmatpush.bf16.msrb.mxu1 %v3337_v16  ;;  %v3397_v16 = vld [vmem:[%s4369_s1 + $0x320] sm:$0xff] }
  0x41   :  { %1887 = vmatpush.bf16.msrb.mxu3 %v3353_v17  ;;  %1846 = vmatmul.bf16.vlgmr.msrb.gmra.mxu0 %v2327_v22  ;;  %v3413_v17 = vld [vmem:[%s4369_s1 + $0x3a0] sm:$0xff]  ;;  %v3404_v22 = vld [vmem:[%s4369_s1 + $0x358] sm:$0xff] }
  0x42   :  { %1894 = vmatpush.bf16.msra.mxu0 %v3368_v10  ;;  %1874 = vmatmul.bf16.vlgmr.msrb.gmra.mxu2 %v2335_v23  ;;  %v3407_v10 = vld [vmem:[%s4369_s1 + $0x370] sm:$0xff]  ;;  %v3420_v23 = vld [vmem:[%s4369_s1 + $0x3d8] sm:$0xff] }
  0x43   :  { %1922 = vmatpush.bf16.msra.mxu2 %v3384_v11  ;;  %1860 = vmatmul.bf16.vlgmr.msrb.gmra.mxu1 %v2331_v26  ;;  %v3423_v11 = vld [vmem:[%s4369_s1 + $0x3f0] sm:$0xff] }
  0x44   :  { %1908 = vmatpush.bf16.msra.mxu1 %v3376_v24  ;;  %1888 = vmatmul.bf16.vlgmr.msrb.gmra.mxu3 %v2339_v27  ;;  %v3395_v24 = vld [vmem:[%s4369_s1 + $0x310] sm:$0xff] }
  0x45   :  { %1936 = vmatpush.bf16.msra.mxu3 %v3392_v25  ;;  %v3411_v25 = vld [vmem:[%s4369_s1 + $0x390] sm:$0xff] }
  0x46   :  { %1895 = vmatpush.bf16.msra.mxu0 %v3367_v28  ;;  %v3403_v26 = vld [vmem:[%s4369_s1 + $0x350] sm:$0xff]  ;;  %v3394_v28 = vld [vmem:[%s4369_s1 + $0x308] sm:$0xff] }
  0x47   :  { %1923 = vmatpush.bf16.msra.mxu2 %v3383_v29  ;;  %v3419_v27 = vld [vmem:[%s4369_s1 + $0x3d0] sm:$0xff]  ;;  %v3410_v29 = vld [vmem:[%s4369_s1 + $0x388] sm:$0xff] }
  0x48   :  { %1909 = vmatpush.bf16.msra.mxu1 %v3375_v30  ;;  %v3402_v30 = vld [vmem:[%s4369_s1 + $0x348] sm:$0xff] }
  0x49   :  { %1937 = vmatpush.bf16.msra.mxu3 %v3391_v31  ;;  %v3418_v31 = vld [vmem:[%s4369_s1 + $0x3c8] sm:$0xff] }
  0x4a   :  { %1896 = vmatpush.bf16.msra.mxu0 %v3366_v32  ;;  %v3393_v32 = vld [vmem:[%s4369_s1 + $0x300] sm:$0xff] }
  0x4b   :  { %1924 = vmatpush.bf16.msra.mxu2 %v3382_v33  ;;  %v3409_v33 = vld [vmem:[%s4369_s1 + $0x380] sm:$0xff] }
  0x4c   :  { %1910 = vmatpush.bf16.msra.mxu1 %v3374_v34  ;;  %v3432_v34 = vld [vmem:[%s4369_s1 + $0x438] sm:$0xff] }
  0x4d   :  { %1938 = vmatpush.bf16.msra.mxu3 %v3390_v35  ;;  %v3448_v35 = vld [vmem:[%s4369_s1 + $0x4b8] sm:$0xff] }
  0x4e   :  { %1897 = vmatpush.bf16.msra.mxu0 %v3365_v36  ;;  %v2358_v36 = vld [vmem:[%s4370_s0 + $0x30] sm:$0xf] }
  0x4f   :  { %1925 = vmatpush.bf16.msra.mxu2 %v3381_v37  ;;  %v3290_v37 = vld [vmem:[%s4370_s0 + $0x90] sm:$0xf0] }
  0x50   :  { %1911 = vmatpush.bf16.msra.mxu1 %v3373_v38  ;;  %v2366_v38 = vld [vmem:[%s4370_s0 + $0x38] sm:$0xf] }
  0x51   :  { %1939 = vmatpush.bf16.msra.mxu3 %v3389_v39  ;;  %v3291_v39 = vld [vmem:[%s4370_s0 + $0x98] sm:$0xf0] }
  0x52   :  { %1898 = vmatpush.bf16.msra.mxu0 %v3364_v40  ;;  %v3401_v40 = vld [vmem:[%s4369_s1 + $0x340] sm:$0xff] }
  0x53   :  { %1926 = vmatpush.bf16.msra.mxu2 %v3380_v41  ;;  %v3417_v41 = vld [vmem:[%s4369_s1 + $0x3c0] sm:$0xff] }
  0x54   :  { %1912 = vmatpush.bf16.msra.mxu1 %v3372_v42  ;;  %v3278_v42 = vld [vmem:[%s4370_s0 + $0x34] sm:$0xf] }
  0x55   :  { %1940 = vmatpush.bf16.msra.mxu3 %v3388_v43  ;;  %v2360_v43 = vld [vmem:[%s4370_s0 + $0x94] sm:$0xf0] }
  0x56   :  { %1899 = vmatpush.bf16.msra.mxu0 %v3363_v44  ;;  %v3279_v44 = vld [vmem:[%s4370_s0 + $0x3c] sm:$0xf] }
  0x57   :  { %1927 = vmatpush.bf16.msra.mxu2 %v3379_v45  ;;  %v2368_v45 = vld [vmem:[%s4370_s0 + $0x9c] sm:$0xf0] }
  0x58   :  { %1913 = vmatpush.bf16.msra.mxu1 %v3371_v46  ;;  %v2359_v46 = vor.u32 %v3290_v37, %v2358_v36  ;;  %v3462_v36 = vld [vmem:[%s4369_s1 + $0x528] sm:$0xff] }
  0x59   :  { %1941 = vmatpush.bf16.msra.mxu3 %v3387_v47  ;;  %v2367_v47 = vor.u32 %v3291_v39, %v2366_v38  ;;  %v3478_v37 = vld [vmem:[%s4369_s1 + $0x5a8] sm:$0xff] }
  0x5a   :  { %1900 = vmatpush.bf16.msra.mxu0 %v3362_v48  ;;  %v3440_v48 = vld [vmem:[%s4369_s1 + $0x478] sm:$0xff]  ;;  %v3470_v38 = vld [vmem:[%s4369_s1 + $0x568] sm:$0xff] }
  0x5b   :  { %1928 = vmatpush.bf16.msra.mxu2 %v3378_v49  ;;  %v3456_v49 = vld [vmem:[%s4369_s1 + $0x4f8] sm:$0xff]  ;;  %v3486_v39 = vld [vmem:[%s4369_s1 + $0x5e8] sm:$0xff] }
  0x5c   :  { %1914 = vmatpush.bf16.msra.mxu1 %v3370_v50  ;;  %v2363_v50 = vor.u32 %v3278_v42, %v2360_v43  ;;  %v3469_v42 = vld [vmem:[%s4369_s1 + $0x560] sm:$0xff] }
  0x5d   :  { %1942 = vmatpush.bf16.msra.mxu3 %v3386_v51  ;;  %v2371_v51 = vor.u32 %v3279_v44, %v2368_v45  ;;  %v3485_v43 = vld [vmem:[%s4369_s1 + $0x5e0] sm:$0xff]  ;;  %v3460_v44 = vld [vmem:[%s4369_s1 + $0x518] sm:$0xff] }
  0x5e   :  { %1901 = vmatpush.bf16.msra.mxu0 %v3361_v52  ;;  %v3431_v52 = vld [vmem:[%s4369_s1 + $0x430] sm:$0xff]  ;;  %v3476_v45 = vld [vmem:[%s4369_s1 + $0x598] sm:$0xff] }
  0x5f   :  { %1929 = vmatpush.bf16.msra.mxu2 %v3377_v53  ;;  %v3447_v53 = vld [vmem:[%s4369_s1 + $0x4b0] sm:$0xff] }
  0x60   :  { %1915 = vmatpush.bf16.msra.mxu1 %v3369_v60  ;;  %v3429_v60 = vld [vmem:[%s4369_s1 + $0x420] sm:$0xff] }
  0x61   :  { %1943 = vmatpush.bf16.msra.mxu3 %v3385_v61  ;;  %1902 = vmatmul.bf16.vlgmr.msra.gmra.mxu0 %v2343_v2  ;;  %v3445_v61 = vld [vmem:[%s4369_s1 + $0x4a0] sm:$0xff]  ;;  %v3436_v2 = vld [vmem:[%s4369_s1 + $0x458] sm:$0xff] }
  0x62   :  { %1950 = vmatpush.bf16.msrb.mxu0 %v3400_v54  ;;  %1930 = vmatmul.bf16.vlgmr.msra.gmra.mxu2 %v2351_v3  ;;  %v3439_v54 = vld [vmem:[%s4369_s1 + $0x470] sm:$0xff]  ;;  %v3452_v3 = vld [vmem:[%s4369_s1 + $0x4d8] sm:$0xff] }
  0x63   :  { %1978 = vmatpush.bf16.msrb.mxu2 %v3416_v55  ;;  %1916 = vmatmul.bf16.vlgmr.msra.gmra.mxu1 %v2347_v6  ;;  %v3455_v55 = vld [vmem:[%s4369_s1 + $0x4f0] sm:$0xff] }
  0x64   :  { %1964 = vmatpush.bf16.msrb.mxu1 %v3408_v4  ;;  %1944 = vmatmul.bf16.vlgmr.msra.gmra.mxu3 %v2355_v7  ;;  %v3427_v4 = vld [vmem:[%s4369_s1 + $0x410] sm:$0xff] }
  0x65   :  { %1992 = vmatpush.bf16.msrb.mxu3 %v3424_v5  ;;  %v3443_v5 = vld [vmem:[%s4369_s1 + $0x490] sm:$0xff] }
  0x66   :  { %1951 = vmatpush.bf16.msrb.mxu0 %v3399_v8  ;;  %v3435_v6 = vld [vmem:[%s4369_s1 + $0x450] sm:$0xff]  ;;  %v3426_v8 = vld [vmem:[%s4369_s1 + $0x408] sm:$0xff] }
  0x67   :  { %1979 = vmatpush.bf16.msrb.mxu2 %v3415_v9  ;;  %v3451_v7 = vld [vmem:[%s4369_s1 + $0x4d0] sm:$0xff]  ;;  %v3442_v9 = vld [vmem:[%s4369_s1 + $0x488] sm:$0xff] }
  0x68   :  { %1965 = vmatpush.bf16.msrb.mxu1 %v3407_v10  ;;  %v3434_v10 = vld [vmem:[%s4369_s1 + $0x448] sm:$0xff] }
  0x69   :  { %1993 = vmatpush.bf16.msrb.mxu3 %v3423_v11  ;;  %v3450_v11 = vld [vmem:[%s4369_s1 + $0x4c8] sm:$0xff] }
  0x6a   :  { %1952 = vmatpush.bf16.msrb.mxu0 %v3398_v12  ;;  %v3425_v12 = vld [vmem:[%s4369_s1 + $0x400] sm:$0xff] }
  0x6b   :  { %1980 = vmatpush.bf16.msrb.mxu2 %v3414_v13  ;;  %v3441_v13 = vld [vmem:[%s4369_s1 + $0x480] sm:$0xff] }
  0x6c   :  { %1966 = vmatpush.bf16.msrb.mxu1 %v3406_v14  ;;  %v3464_v14 = vld [vmem:[%s4369_s1 + $0x538] sm:$0xff] }
  0x6d   :  { %1994 = vmatpush.bf16.msrb.mxu3 %v3422_v15  ;;  %v3480_v15 = vld [vmem:[%s4369_s1 + $0x5b8] sm:$0xff] }
  0x6e   :  { %1953 = vmatpush.bf16.msrb.mxu0 %v3397_v16  ;;  %v2374_v16 = vld [vmem:[%s4370_s0 + $0x40] sm:$0xf] }
  0x6f   :  { %1981 = vmatpush.bf16.msrb.mxu2 %v3413_v17  ;;  %v3292_v17 = vld [vmem:[%s4370_s0 + $0xa0] sm:$0xf0] }
  0x70   :  { %1967 = vmatpush.bf16.msrb.mxu1 %v3405_v18  ;;  %v2382_v18 = vld [vmem:[%s4370_s0 + $0x48] sm:$0xf] }
  0x71   :  { %1995 = vmatpush.bf16.msrb.mxu3 %v3421_v19  ;;  %v3293_v19 = vld [vmem:[%s4370_s0 + $0xa8] sm:$0xf0] }
  0x72   :  { %1954 = vmatpush.bf16.msrb.mxu0 %v3396_v20  ;;  %v3433_v20 = vld [vmem:[%s4369_s1 + $0x440] sm:$0xff] }
  0x73   :  { %1982 = vmatpush.bf16.msrb.mxu2 %v3412_v21  ;;  %v3449_v21 = vld [vmem:[%s4369_s1 + $0x4c0] sm:$0xff] }
  0x74   :  { %1968 = vmatpush.bf16.msrb.mxu1 %v3404_v22  ;;  %v3280_v22 = vld [vmem:[%s4370_s0 + $0x44] sm:$0xf] }
  0x75   :  { %1996 = vmatpush.bf16.msrb.mxu3 %v3420_v23  ;;  %v2376_v23 = vld [vmem:[%s4370_s0 + $0xa4] sm:$0xf0] }
  0x76   :  { %1955 = vmatpush.bf16.msrb.mxu0 %v3395_v24  ;;  %v3281_v24 = vld [vmem:[%s4370_s0 + $0x4c] sm:$0xf] }
  0x77   :  { %1983 = vmatpush.bf16.msrb.mxu2 %v3411_v25  ;;  %v2384_v25 = vld [vmem:[%s4370_s0 + $0xac] sm:$0xf0] }
  0x78   :  { %1969 = vmatpush.bf16.msrb.mxu1 %v3403_v26  ;;  %v2375_v26 = vor.u32 %v3292_v17, %v2374_v16  ;;  %v2406_v16 = vld [vmem:[%s4370_s0 + $0x60] sm:$0xf]  ;;  %v3296_v17 = vld [vmem:[%s4370_s0 + $0xc0] sm:$0xf0] }
  0x79   :  { %1997 = vmatpush.bf16.msrb.mxu3 %v3419_v27  ;;  %v2383_v27 = vor.u32 %v3293_v19, %v2382_v18  ;;  %v2407_v18 = vor.u32 %v3296_v17, %v2406_v16 }
  0x7a   :  { %1956 = vmatpush.bf16.msrb.mxu0 %v3394_v28  ;;  %v3472_v28 = vld [vmem:[%s4369_s1 + $0x578] sm:$0xff] }
  0x7b   :  { %1984 = vmatpush.bf16.msrb.mxu2 %v3410_v29  ;;  %v3488_v29 = vld [vmem:[%s4369_s1 + $0x5f8] sm:$0xff] }
  0x7c   :  { %1970 = vmatpush.bf16.msrb.mxu1 %v3402_v30  ;;  %v2379_v30 = vor.u32 %v3280_v22, %v2376_v23 }
  0x7d   :  { %1998 = vmatpush.bf16.msrb.mxu3 %v3418_v31  ;;  %v2387_v31 = vor.u32 %v3281_v24, %v2384_v25 }
  0x7e   :  { %1957 = vmatpush.bf16.msrb.mxu0 %v3393_v32  ;;  %v3463_v32 = vld [vmem:[%s4369_s1 + $0x530] sm:$0xff] }
  0x7f   :  { %1985 = vmatpush.bf16.msrb.mxu2 %v3409_v33  ;;  %v3479_v33 = vld [vmem:[%s4369_s1 + $0x5b0] sm:$0xff] }
  0x80   :  { %1971 = vmatpush.bf16.msrb.mxu1 %v3401_v40  ;;  %v3461_v40 = vld [vmem:[%s4369_s1 + $0x520] sm:$0xff] }
  0x81   :  { %1999 = vmatpush.bf16.msrb.mxu3 %v3417_v41  ;;  %1958 = vmatmul.bf16.vlgmr.msrb.gmra.mxu0 %v2359_v46  ;;  %v3477_v41 = vld [vmem:[%s4369_s1 + $0x5a0] sm:$0xff]  ;;  %v3468_v46 = vld [vmem:[%s4369_s1 + $0x558] sm:$0xff] }
  0x82   :  { %2006 = vmatpush.bf16.msra.mxu0 %v3432_v34  ;;  %1986 = vmatmul.bf16.vlgmr.msrb.gmra.mxu2 %v2367_v47  ;;  %v3471_v34 = vld [vmem:[%s4369_s1 + $0x570] sm:$0xff]  ;;  %v3484_v47 = vld [vmem:[%s4369_s1 + $0x5d8] sm:$0xff] }
  0x83   :  { %2034 = vmatpush.bf16.msra.mxu2 %v3448_v35  ;;  %1972 = vmatmul.bf16.vlgmr.msrb.gmra.mxu1 %v2363_v50  ;;  %v3487_v35 = vld [vmem:[%s4369_s1 + $0x5f0] sm:$0xff] }
  0x84   :  { %2020 = vmatpush.bf16.msra.mxu1 %v3440_v48  ;;  %2000 = vmatmul.bf16.vlgmr.msrb.gmra.mxu3 %v2371_v51  ;;  %v3459_v48 = vld [vmem:[%s4369_s1 + $0x510] sm:$0xff] }
  0x85   :  { %2048 = vmatpush.bf16.msra.mxu3 %v3456_v49  ;;  %v3475_v49 = vld [vmem:[%s4369_s1 + $0x590] sm:$0xff] }
  0x86   :  { %2007 = vmatpush.bf16.msra.mxu0 %v3431_v52  ;;  %v3467_v50 = vld [vmem:[%s4369_s1 + $0x550] sm:$0xff]  ;;  %v3458_v52 = vld [vmem:[%s4369_s1 + $0x508] sm:$0xff] }
  0x87   :  { %2035 = vmatpush.bf16.msra.mxu2 %v3447_v53  ;;  %v3483_v51 = vld [vmem:[%s4369_s1 + $0x5d0] sm:$0xff]  ;;  %v3474_v53 = vld [vmem:[%s4369_s1 + $0x588] sm:$0xff] }
  0x88   :  { %2021 = vmatpush.bf16.msra.mxu1 %v3439_v54  ;;  %v3466_v54 = vld [vmem:[%s4369_s1 + $0x548] sm:$0xff] }
  0x89   :  { %2049 = vmatpush.bf16.msra.mxu3 %v3455_v55  ;;  %v3482_v55 = vld [vmem:[%s4369_s1 + $0x5c8] sm:$0xff] }
  0x8a   :  { %2008 = vmatpush.bf16.msra.mxu0 %v3430_v56  ;;  %v3457_v56 = vld [vmem:[%s4369_s1 + $0x500] sm:$0xff] }
  0x8b   :  { %2036 = vmatpush.bf16.msra.mxu2 %v3446_v57  ;;  %v3473_v57 = vld [vmem:[%s4369_s1 + $0x580] sm:$0xff] }
  0x8c   :  { %2022 = vmatpush.bf16.msra.mxu1 %v3438_v58  ;;  %v3496_v58 = vld [vmem:[%s4369_s1 + $0x638] sm:$0xff] }
  0x8d   :  { %2050 = vmatpush.bf16.msra.mxu3 %v3454_v59  ;;  %v2390_v59 = vld [vmem:[%s4370_s0 + $0x50] sm:$0xf] }
  0x8e   :  { %2009 = vmatpush.bf16.msra.mxu0 %v3429_v60  ;;  %v3294_v60 = vld [vmem:[%s4370_s0 + $0xb0] sm:$0xf0] }
  0x8f   :  { %2037 = vmatpush.bf16.msra.mxu2 %v3445_v61  ;;  %v2398_v61 = vld [vmem:[%s4370_s0 + $0x58] sm:$0xf] }
  0x90   :  { %2023 = vmatpush.bf16.msra.mxu1 %v3437_v62  ;;  %v3295_v62 = vld [vmem:[%s4370_s0 + $0xb8] sm:$0xf0] }
  0x91   :  { %2051 = vmatpush.bf16.msra.mxu3 %v3453_v63  ;;  %v3465_v63 = vld [vmem:[%s4369_s1 + $0x540] sm:$0xff] }
  0x92   :  { %2010 = vmatpush.bf16.msra.mxu0 %v3428_v0  ;;  %v3481_v0 = vld [vmem:[%s4369_s1 + $0x5c0] sm:$0xff] }
  0x93   :  { %2038 = vmatpush.bf16.msra.mxu2 %v3444_v1  ;;  %v3282_v1 = vld [vmem:[%s4370_s0 + $0x54] sm:$0xf] }
  0x94   :  { %2024 = vmatpush.bf16.msra.mxu1 %v3436_v2  ;;  %v2392_v2 = vld [vmem:[%s4370_s0 + $0xb4] sm:$0xf0] }
  0x95   :  { %2052 = vmatpush.bf16.msra.mxu3 %v3452_v3  ;;  %v3283_v3 = vld [vmem:[%s4370_s0 + $0x5c] sm:$0xf] }
  0x96   :  { %2011 = vmatpush.bf16.msra.mxu0 %v3427_v4  ;;  %v2400_v4 = vld [vmem:[%s4370_s0 + $0xbc] sm:$0xf0] }
  0x97   :  { %2039 = vmatpush.bf16.msra.mxu2 %v3443_v5  ;;  %v2391_v5 = vor.u32 %v3294_v60, %v2390_v59 }
  0x98   :  { %2025 = vmatpush.bf16.msra.mxu1 %v3435_v6  ;;  %v2399_v6 = vor.u32 %v3295_v62, %v2398_v61  ;;  %v3503_v61 = vld [vmem:[%s4373_s3 + $0x30] sm:$0xff] }
  0x99   :  { %2053 = vmatpush.bf16.msra.mxu3 %v3451_v7  ;;  %v2395_v7 = vor.u32 %v3282_v1, %v2392_v2 }
  0x9a   :  { %2012 = vmatpush.bf16.msra.mxu0 %v3426_v8  ;;  %v2403_v8 = vor.u32 %v3283_v3, %v2400_v4 }
  0x9b   :  { %2040 = vmatpush.bf16.msra.mxu2 %v3442_v9  ;;  %v3495_v9 = vld [vmem:[%s4369_s1 + $0x630] sm:$0xff] }
  0x9c   :  { %2026 = vmatpush.bf16.msra.mxu1 %v3434_v10  ;;  %v3494_v10 = vld [vmem:[%s4369_s1 + $0x628] sm:$0xff] }
  0x9d   :  { %2054 = vmatpush.bf16.msra.mxu3 %v3450_v11  ;;  %v3493_v11 = vld [vmem:[%s4369_s1 + $0x620] sm:$0xff] }
  0x9e   :  { %2013 = vmatpush.bf16.msra.mxu0 %v3425_v12  ;;  %v3492_v12 = vld [vmem:[%s4369_s1 + $0x618] sm:$0xff]  ;;  %v1791_v19 = vpop.f32.mrf.mxu0 }
  0x9f   :  { %2041 = vmatpush.bf16.msra.mxu2 %v3441_v13  ;;  %v3491_v13 = vld [vmem:[%s4369_s1 + $0x610] sm:$0xff] }
  0xa0   :  { %2027 = vmatpush.bf16.msra.mxu1 %v3433_v20  ;;  %v1805_v20 = vpop.f32.mrf.mxu1 }
  0xa1   :  { %2055 = vmatpush.bf16.msra.mxu3 %v3449_v21  ;;  %2014 = vmatmul.bf16.vlgmr.msra.gmra.mxu0 %v2375_v26 }
  0xa2   :  { %2062 = vmatpush.bf16.msrb.mxu0 %v3464_v14  ;;  %2042 = vmatmul.bf16.vlgmr.msra.gmra.mxu2 %v2383_v27  ;;  %v3490_v14 = vld [vmem:[%s4369_s1 + $0x608] sm:$0xff] }
  0xa3   :  { %2090 = vmatpush.bf16.msrb.mxu2 %v3480_v15  ;;  %2028 = vmatmul.bf16.vlgmr.msra.gmra.mxu1 %v2379_v30  ;;  %v3489_v15 = vld [vmem:[%s4369_s1 + $0x600] sm:$0xff] }
  0xa4   :  { %2076 = vmatpush.bf16.msrb.mxu1 %v3472_v28  ;;  %2056 = vmatmul.bf16.vlgmr.msra.gmra.mxu3 %v2387_v31 }
  0xa5   :  { %2104 = vmatpush.bf16.msrb.mxu3 %v3488_v29  ;;  %v1819_v21 = vpop.f32.mrf.mxu2 }
  0xa6   :  { %2063 = vmatpush.bf16.msrb.mxu0 %v3463_v32  ;;  %v1793_v22 = vpop.f32.mrf.mxu0  ;;  %v3513_v32 = vld [vmem:[%s4371_s2] ss:$0 sm:$0xff] }
  0xa7   :  { %2091 = vmatpush.bf16.msrb.mxu2 %v3479_v33  ;;  %v1833_v23 = vpop.f32.mrf.mxu3 }
  0xa8   :  { %2077 = vmatpush.bf16.msrb.mxu1 %v3471_v34  ;;  %v1807_v24 = vpop.f32.mrf.mxu1 }
  0xa9   :  { %2105 = vmatpush.bf16.msrb.mxu3 %v3487_v35 }
  0xaa   :  { %2064 = vmatpush.bf16.msrb.mxu0 %v3462_v36  ;;  %v1792_v36 = vadd.f32 %v3513_v32, %v1791_v19 }
  0xab   :  { %2092 = vmatpush.bf16.msrb.mxu2 %v3478_v37 }
  0xac   :  { %2078 = vmatpush.bf16.msrb.mxu1 %v3470_v38  ;;  %v1806_v38 = vadd.f32 %v1805_v20, %v1792_v36 }
  0xad   :  { %2106 = vmatpush.bf16.msrb.mxu3 %v3486_v39  ;;  %v1821_v25 = vpop.f32.mrf.mxu2 }
  0xae   :  { %2065 = vmatpush.bf16.msrb.mxu0 %v3461_v40  ;;  %v1794_v40 = vadd.f32 %v3513_v32, %v1793_v22 }
  0xaf   :  { %2093 = vmatpush.bf16.msrb.mxu2 %v3477_v41  ;;  %v1835_v27 = vpop.f32.mrf.mxu3 }
  0xb0   :  { %2079 = vmatpush.bf16.msrb.mxu1 %v3469_v42  ;;  %v1820_v42 = vadd.f32 %v1819_v21, %v1806_v38 }
  0xb1   :  { %2107 = vmatpush.bf16.msrb.mxu3 %v3485_v43 }
  0xb2   :  { %2066 = vmatpush.bf16.msrb.mxu0 %v3460_v44  ;;  %v1808_v44 = vadd.f32 %v1807_v24, %v1794_v40  ;;  %v3498_v24 = vld [vmem:[%s4373_s3 + $0x8] sm:$0xff] }
  0xb3   :  { %2094 = vmatpush.bf16.msrb.mxu2 %v3476_v45 }
  0xb4   :  { %2080 = vmatpush.bf16.msrb.mxu1 %v3468_v46  ;;  %v1834_v46 = vadd.f32 %v1833_v23, %v1820_v42 }
  0xb5   :  { %2108 = vmatpush.bf16.msrb.mxu3 %v3484_v47  ;;  %v1822_v47 = vadd.f32 %v1821_v25, %v1808_v44 }
  0xb6   :  { %2067 = vmatpush.bf16.msrb.mxu0 %v3459_v48 }
  0xb7   :  { %2095 = vmatpush.bf16.msrb.mxu2 %v3475_v49 }
  0xb8   :  { %2081 = vmatpush.bf16.msrb.mxu1 %v3467_v50 }
  0xb9   :  { %2109 = vmatpush.bf16.msrb.mxu3 %v3483_v51 }
  0xba   :  { %2068 = vmatpush.bf16.msrb.mxu0 %v3458_v52  ;;  %v1836_v52 = vadd.f32 %v1835_v27, %v1822_v47 }
  0xbb   :  { %2096 = vmatpush.bf16.msrb.mxu2 %v3474_v53 }
  0xbc   :  { %2082 = vmatpush.bf16.msrb.mxu1 %v3466_v54 }
  0xbd   :  { %2110 = vmatpush.bf16.msrb.mxu3 %v3482_v55  ;;  %v3504_v55 = vld [vmem:[%s4373_s3 + $0x38] sm:$0xff] }
  0xbe   :  { %2069 = vmatpush.bf16.msrb.mxu0 %v3457_v56  ;;  %v1847_v26 = vpop.f32.mrf.mxu0 }
  0xbf   :  { %2097 = vmatpush.bf16.msrb.mxu2 %v3473_v57  ;;  %v1848_v49 = vadd.f32 %v1847_v26, %v1834_v46 }
  0xc0   :  { %2083 = vmatpush.bf16.msrb.mxu1 %v3465_v63  ;;  %v1861_v28 = vpop.f32.mrf.mxu1 }
  0xc1   :  { %2111 = vmatpush.bf16.msrb.mxu3 %v3481_v0  ;;  %2070 = vmatmul.bf16.vlgmr.msrb.gmra.mxu0 %v2391_v5  ;;  %v1862_v53 = vadd.f32 %v1861_v28, %v1848_v49  ;;  %v3502_v0 = vld [vmem:[%s4373_s3 + $0x28] sm:$0xff]  ;;  %v3501_v5 = vld [vmem:[%s4373_s3 + $0x20] sm:$0xff] }
  0xc2   :  { %2118 = vmatpush.bf16.msra.mxu0 %v3496_v58  ;;  %2098 = vmatmul.bf16.vlgmr.msrb.gmra.mxu2 %v2399_v6 }
  0xc3   :  { %2084 = vmatmul.bf16.vlgmr.msrb.gmra.mxu1 %v2395_v7 }
  0xc4   :  { %2112 = vmatmul.bf16.vlgmr.msrb.gmra.mxu3 %v2403_v8  ;;  %2203 = vmatpush.bf16.msra.mxu1 %v3504_v55 }
  0xc5   :  { %v1875_v29 = vpop.f32.mrf.mxu2 }
  0xc6   :  { %2119 = vmatpush.bf16.msra.mxu0 %v3495_v9  ;;  %v1849_v30 = vpop.f32.mrf.mxu0  ;;  %v1876_v58 = vadd.f32 %v1875_v29, %v1862_v53  ;;  %v3497_v29 = vld [vmem:[%s4373_s3] sm:$0xff] }
  0xc7   :  { %v1889_v31 = vpop.f32.mrf.mxu3  ;;  %v1850_v54 = vadd.f32 %v1849_v30, %v1836_v52 }
  0xc8   :  { %v1863_v33 = vpop.f32.mrf.mxu1  ;;  %2204 = vmatpush.bf16.msra.mxu1 %v3503_v61  ;;  %v1890_v1 = vadd.f32 %v1889_v31, %v1876_v58 }
  0xc9   :  { %v1864_v59 = vadd.f32 %v1863_v33, %v1850_v54 }
  0xca   :  { %2120 = vmatpush.bf16.msra.mxu0 %v3494_v10 }
  0xcc   :  { %2205 = vmatpush.bf16.msra.mxu1 %v3502_v0 }
  0xcd   :  { %v1877_v34 = vpop.f32.mrf.mxu2 }
  0xce   :  { %2121 = vmatpush.bf16.msra.mxu0 %v3493_v11  ;;  %v1878_v62 = vadd.f32 %v1877_v34, %v1864_v59 }
  0xcf   :  { %v1891_v37 = vpop.f32.mrf.mxu3 }
  0xd0   :  { %v1892_v3 = vadd.f32 %v1891_v37, %v1878_v62  ;;  %2206 = vmatpush.bf16.msra.mxu1 %v3501_v5  ;;  %v3512_v37 = vld [vmem:[%s4374_s5 + $0x38] sm:$0xff] }
  0xd1   :  { %2288 = vmatpush.bf16.msra.mxu2 %v3512_v37 }
  0xd2   :  { %2122 = vmatpush.bf16.msra.mxu0 %v3492_v12 }
  0xd6   :  { %2123 = vmatpush.bf16.msra.mxu0 %v3491_v13  ;;  %v3500_v13 = vld [vmem:[%s4373_s3 + $0x18] sm:$0xff] }
  0xd7   :  { %2207 = vmatpush.bf16.msra.mxu1 %v3500_v13 }
  0xda   :  { %2124 = vmatpush.bf16.msra.mxu0 %v3490_v14 }
  0xde   :  { %2125 = vmatpush.bf16.msra.mxu0 %v3489_v15  ;;  %v1903_v35 = vpop.f32.mrf.mxu0 }
  0xdf   :  { %v1904_v4 = vadd.f32 %v1903_v35, %v1890_v1 }
  0xe0   :  { %v1917_v39 = vpop.f32.mrf.mxu1 }
  0xe1   :  { %2126 = vmatmul.bf16.vlgmr.msra.gmra.mxu0 %v2407_v18  ;;  %v1918_v8 = vadd.f32 %v1917_v39, %v1904_v4  ;;  %v3499_v18 = vld [vmem:[%s4373_s3 + $0x10] sm:$0xff] }
  0xe2   :  { %2208 = vmatpush.bf16.msra.mxu1 %v3499_v18  ;;  %v3511_v39 = vld [vmem:[%s4374_s5 + $0x30] sm:$0xff] }
  0xe3   :  { %2289 = vmatpush.bf16.msra.mxu2 %v3511_v39 }
  0xe5   :  { %v1931_v41 = vpop.f32.mrf.mxu2 }
  0xe6   :  { %v1905_v43 = vpop.f32.mrf.mxu0  ;;  %v1932_v11 = vadd.f32 %v1931_v41, %v1918_v8  ;;  %2209 = vmatpush.bf16.msra.mxu1 %v3498_v24  ;;  %v3507_v8 = vld [vmem:[%s4374_s5 + $0x10] sm:$0xff] }
  0xe7   :  { %v1945_v45 = vpop.f32.mrf.mxu3  ;;  %v1906_v6 = vadd.f32 %v1905_v43, %v1892_v3 }
  0xe8   :  { %v1919_v48 = vpop.f32.mrf.mxu1  ;;  %v1946_v16 = vadd.f32 %v1945_v45, %v1932_v11  ;;  %v3510_v45 = vld [vmem:[%s4374_s5 + $0x28] sm:$0xff] }
  0xe9   :  { %v1920_v12 = vadd.f32 %v1919_v48, %v1906_v6  ;;  %2290 = vmatpush.bf16.msra.mxu2 %v3510_v45 }
  0xea   :  { %2210 = vmatpush.bf16.msra.mxu1 %v3497_v29 }
  0xed   :  { %v1933_v50 = vpop.f32.mrf.mxu2 }
  0xee   :  { %v1934_v14 = vadd.f32 %v1933_v50, %v1920_v12  ;;  %v3509_v50 = vld [vmem:[%s4374_s5 + $0x20] sm:$0xff] }
  0xef   :  { %v1947_v56 = vpop.f32.mrf.mxu3  ;;  %2291 = vmatpush.bf16.msra.mxu2 %v3509_v50  ;;  %v3514_v12 = vld [vmem:[%s4372_s4] ss:$0 sm:$0xff] }
  0xf0   :  { %v1948_v19 = vadd.f32 %v1947_v56, %v1934_v14 }
  0xfe   :  { %v1959_v51 = vpop.f32.mrf.mxu0 }
  0xff   :  { %v1960_v20 = vadd.f32 %v1959_v51, %v1946_v16 }
 0x100   :  { %v1973_v57 = vpop.f32.mrf.mxu1 }
 0x101   :  { %v1974_v25 = vadd.f32 %v1973_v57, %v1960_v20 }
 0x105   :  { %v1987_v60 = vpop.f32.mrf.mxu2 }
 0x106   :  { %v1961_v63 = vpop.f32.mrf.mxu0  ;;  %v1988_v27 = vadd.f32 %v1987_v60, %v1974_v25 }
 0x107   :  { %v2001_v2 = vpop.f32.mrf.mxu3  ;;  %v1962_v22 = vadd.f32 %v1961_v63, %v1948_v19  ;;  %v3515_v19 = vld [vmem:[%s4375_s6] ss:$0 sm:$0xff] }
 0x108   :  { %v1975_v7 = vpop.f32.mrf.mxu1  ;;  %v2002_v32 = vadd.f32 %v2001_v2, %v1988_v27 }
 0x109   :  { %v1976_v28 = vadd.f32 %v1975_v7, %v1962_v22  ;;  %v3508_v7 = vld [vmem:[%s4374_s5 + $0x18] sm:$0xff] }
 0x10a   :  { %2292 = vmatpush.bf16.msra.mxu2 %v3508_v7 }
 0x10d   :  { %v1989_v9 = vpop.f32.mrf.mxu2 }
 0x10e   :  { %v1990_v30 = vadd.f32 %v1989_v9, %v1976_v28  ;;  %2293 = vmatpush.bf16.msra.mxu2 %v3507_v8  ;;  %v3506_v9 = vld [vmem:[%s4374_s5 + $0x8] sm:$0xff] }
 0x10f   :  { %v2003_v15 = vpop.f32.mrf.mxu3 }
 0x110   :  { %v2004_v35 = vadd.f32 %v2003_v15, %v1990_v30 }
 0x112   :  { %2294 = vmatpush.bf16.msra.mxu2 %v3506_v9 }
 0x11e   :  { %v2015_v10 = vpop.f32.mrf.mxu0 }
 0x11f   :  { %v2016_v36 = vadd.f32 %v2015_v10, %v2002_v32  ;;  %v3505_v10 = vld [vmem:[%s4374_s5] sm:$0xff] }
 0x120   :  { %v2029_v17 = vpop.f32.mrf.mxu1  ;;  %2295 = vmatpush.bf16.msra.mxu2 %v3505_v10 }
 0x121   :  { %v2030_v41 = vadd.f32 %v2029_v17, %v2016_v36 }
 0x125   :  { %v2043_v21 = vpop.f32.mrf.mxu2 }
 0x126   :  { %v2017_v23 = vpop.f32.mrf.mxu0  ;;  %v2044_v43 = vadd.f32 %v2043_v21, %v2030_v41 }
 0x127   :  { %v2057_v26 = vpop.f32.mrf.mxu3  ;;  %v2018_v38 = vadd.f32 %v2017_v23, %v2004_v35 }
 0x128   :  { %v2031_v31 = vpop.f32.mrf.mxu1  ;;  %v2058_v49 = vadd.f32 %v2057_v26, %v2044_v43 }
 0x129   :  { %v2032_v44 = vadd.f32 %v2031_v31, %v2018_v38 }
 0x12d   :  { %v2045_v33 = vpop.f32.mrf.mxu2 }
 0x12e   :  { %v2046_v47 = vadd.f32 %v2045_v33, %v2032_v44 }
 0x12f   :  { %v2059_v40 = vpop.f32.mrf.mxu3 }
 0x130   :  { %v2060_v52 = vadd.f32 %v2059_v40, %v2046_v47 }
 0x13e   :  { %v2071_v34 = vpop.f32.mrf.mxu0 }
 0x13f   :  { %v2072_v53 = vadd.f32 %v2071_v34, %v2058_v49 }
 0x140   :  { %v2085_v42 = vpop.f32.mrf.mxu1 }
 0x141   :  { %v2086_v56 = vadd.f32 %v2085_v42, %v2072_v53 }
 0x145   :  { %v2099_v46 = vpop.f32.mrf.mxu2 }
 0x146   :  { %v2073_v48 = vpop.f32.mrf.mxu0  ;;  %v2100_v59 = vadd.f32 %v2099_v46, %v2086_v56 }
 0x147   :  { %v2113_v51 = vpop.f32.mrf.mxu3  ;;  %v2074_v54 = vadd.f32 %v2073_v48, %v2060_v52 }
 0x148   :  { %v2087_v55 = vpop.f32.mrf.mxu1  ;;  %v2114_v63 = vadd.f32 %v2113_v51, %v2100_v59 }
 0x149   :  { %v2088_v60 = vadd.f32 %v2087_v55, %v2074_v54 }
 0x14d   :  { %v2101_v57 = vpop.f32.mrf.mxu2 }
 0x14e   :  { %v2102_v61 = vadd.f32 %v2101_v57, %v2088_v60 }
 0x14f   :  { %v2115_v62 = vpop.f32.mrf.mxu3 }
 0x150   :  { %v2116_v0 = vadd.f32 %v2115_v62, %v2102_v61 }
 0x15e   :  { %v2127_v58 = vpop.f32.mrf.mxu0 }
 0x15f   :  { %v2128_v1 = vadd.f32 %v2127_v58, %v2114_v63 }
 0x161   :  { %v2132_v4 = vmax.f32 %v2128_v1, 0.0 }
 0x166   :  { %v2129_v2 = vpop.f32.mrf.mxu0 }
 0x167   :  { %v2130_v3 = vadd.f32 %v2129_v2, %v2116_v0 }
 0x169   :  { %v2133_v5 = vmax.f32 %v2130_v3, 0.0 }
 0x16b   :  { %v2134_v6 = vpack.c.bf16 %v2133_v5, %v2132_v4 }
 0x16d   :  { %2211 = vmatmul.bf16.vlgmr.msra.gmra.mxu1 %v2134_v6 }
 0x1ea   :  { %v2212_v11 = vpop.f32.mrf.mxu1 }
 0x1eb   :  { %v2213_v13 = vadd.f32 %v3514_v12, %v2212_v11 }
 0x1ed   :  { %v2217_v16 = vmax.f32 %v2213_v13, 0.0 }
 0x1f2   :  { %v2214_v14 = vpop.f32.mrf.mxu1 }
 0x1f3   :  { %v2215_v15 = vadd.f32 %v3514_v12, %v2214_v14 }
 0x1f5   :  { %v2218_v17 = vmax.f32 %v2215_v15, 0.0 }
 0x1f7   :  { %v2219_v18 = vpack.c.bf16 %v2218_v17, %v2217_v16 }
 0x1f9   :  { %2296 = vmatmul.bf16.vlgmr.msra.gmra.mxu2 %v2219_v18 }
 0x27c   :  { %v2297_v20 = vpop.f32.mrf.mxu2 }
 0x27d   :  { %v2298_v21 = vadd.f32 %v3515_v19, %v2297_v20 }
 0x27f   :  { %2302 = vst [vmem:[%s4376_s7] sm:$0xff] %v2298_v21 }
 0x284   :  { %v2299_v22 = vpop.f32.mrf.mxu2 }
 0x285   :  { %v2300_v23 = vadd.f32 %v3515_v19, %v2299_v22 }
 0x287   :  { %2303 = vst [vmem:[%s4376_s7 + $0x8] sm:$0xff] %v2300_v23 }

</bundles_post_ra>
